<compile_context>
chip_gen: v7x
topology: tpu7x:2x2x1
jax: 0.10.0
libtpu: 0.0.40
codegen_flags: <defaults>
</compile_context>

<pallas_src>
import functools
import math

import jax
import jax.numpy as jnp
from jax.experimental import pallas as pl
from jax.experimental.pallas import tpu as pltpu
import numpy as np


def encoder_block_kernel(
    x_ref,                      # (Bt, S, D)   io dtype (compute_dtype)
    wqkv_ref, bqkv_ref,         # (D, 3*H*A) compute_dtype, (1, 3*H*A) f32  (scale folded into q cols)
    wp_ref, bp_ref,             # (H, A, D) compute_dtype, (1, D) f32
    g1_ref, beta1_ref,          # (1, D) f32, (1, D) f32
    w1_ref, b1_ref,             # (D, F) compute_dtype, (1, F) f32
    w2_ref, b2_ref,             # (F, D) compute_dtype, (1, D) f32
    g2_ref, beta2_ref,          # (1, D) f32, (1, D) f32
    o_ref,                      # (Bt, S, D)   io dtype
    *, num_heads, attn_features, eps, compute_dtype, batched_heads):
  Bt, S, D = x_ref.shape
  H, A = num_heads, attn_features
  HA = H * A
  M = Bt * S
  approx = jnp.dtype(compute_dtype) != jnp.dtype(jnp.float32)

  x_in = x_ref[...].reshape(M, D)
  x_f32 = x_in.astype(jnp.float32)          # residual path stays in f32
  xc = x_in.astype(compute_dtype)

  # ---- Fused Q/K/V projection: one lane-dense MXU matmul (N = 3*H*A). ----
  # 1/sqrt(A) is already folded into the q columns of wqkv/bqkv (wrapper).
  qkv = jnp.dot(xc, wqkv_ref[...],
                preferred_element_type=jnp.float32) + bqkv_ref[...]

  def _softmax(s):
    s = s - jnp.max(s, axis=-1, keepdims=True)
    p = jnp.exp(s)
    # approx reciprocal (EUP) only on the low-precision path; exact for f32.
    return p * pl.reciprocal(jnp.sum(p, axis=-1, keepdims=True), approx=approx)

  attn = None
  if batched_heads:
    # ---- All heads in one batched contraction (no per-head lane slicing). ----
    q = qkv[:, 0 * HA:1 * HA].reshape(Bt, S, H, A).astype(compute_dtype)
    k = qkv[:, 1 * HA:2 * HA].reshape(Bt, S, H, A).astype(compute_dtype)
    v = qkv[:, 2 * HA:3 * HA].reshape(Bt, S, H, A).astype(compute_dtype)
    s = jnp.einsum("bqha,bkha->bhqk", q, k,
                   preferred_element_type=jnp.float32)        # (Bt,H,S,S)
    p = _softmax(s).astype(compute_dtype)
    heads = jnp.einsum("bhqk,bkha->bhqa", p, v,
                       preferred_element_type=jnp.float32)    # (Bt,H,S,A)
    # Output projection as repeated dot-accumulate into one f32 accumulator
    # (no (b,h,s,a)->(b,s,h,a) relayout, no scratch write/reload).
    for h in range(H):
      oh = heads[:, h].reshape(M, A).astype(compute_dtype)
      c = jnp.dot(oh, wp_ref[h], preferred_element_type=jnp.float32)
      attn = c if attn is None else attn + c
  else:
    # ---- Fallback: per-head loop (single-batch-dim einsums only). ----
    for h in range(H):
      qh = qkv[:, 0 * HA + h * A: 0 * HA + (h + 1) * A].reshape(Bt, S, A)
      kh = qkv[:, 1 * HA + h * A: 1 * HA + (h + 1) * A].reshape(Bt, S, A)
      vh = qkv[:, 2 * HA + h * A: 2 * HA + (h + 1) * A].reshape(Bt, S, A)
      s = jnp.einsum("bqa,bka->bqk", qh.astype(compute_dtype),
                     kh.astype(compute_dtype),
                     preferred_element_type=jnp.float32)
      p = _softmax(s).astype(compute_dtype)
      oh = jnp.einsum("bqk,bka->bqa", p, vh.astype(compute_dtype),
                      preferred_element_type=jnp.float32)      # (Bt,S,A)
      c = jnp.dot(oh.reshape(M, A).astype(compute_dtype), wp_ref[h],
                  preferred_element_type=jnp.float32)
      attn = c if attn is None else attn + c
  attn = attn + bp_ref[...]

  # dropout == identity (eval mode); residual + LayerNorm #1 (f32 stats)
  x1 = x_f32 + attn
  mu1 = jnp.mean(x1, axis=-1, keepdims=True)
  var1 = jnp.mean((x1 - mu1) ** 2, axis=-1, keepdims=True)
  x1 = (x1 - mu1) * jax.lax.rsqrt(var1 + eps) * g1_ref[...] + beta1_ref[...]

  # ---- FFN: Linear -> ReLU -> Linear (M = Bt*S rows per matmul) ----
  h1 = jnp.dot(x1.astype(compute_dtype), w1_ref[...],
               preferred_element_type=jnp.float32) + b1_ref[...]
  h1 = jnp.maximum(h1, 0.0)
  ffn = jnp.dot(h1.astype(compute_dtype), w2_ref[...],
                preferred_element_type=jnp.float32) + b2_ref[...]

  # dropout == identity; residual + LayerNorm #2
  x2 = x1 + ffn
  mu2 = jnp.mean(x2, axis=-1, keepdims=True)
  var2 = jnp.mean((x2 - mu2) ** 2, axis=-1, keepdims=True)
  y = (x2 - mu2) * jax.lax.rsqrt(var2 + eps) * g2_ref[...] + beta2_ref[...]
  o_ref[...] = y.reshape(Bt, S, D).astype(o_ref.dtype)


def _vmem_capacity_bytes():
  """Physical VMEM per TensorCore (128 MiB v5e/v6e, 64 MiB v7x); safe default."""
  try:
    info = pltpu.get_tpu_info()
    cap = getattr(info, "vmem_capacity_bytes", None)
    if cap:
      return int(cap)
  except Exception:
    pass
  return 64 * 1024 * 1024     # conservative (v7x per-TC figure)


def _choose_batch_tile(B, S, step_bytes, budget, target_rows=512):
  """Largest batch tile that fits `budget`, preferring >=target_rows matmul rows
  and guaranteeing >=2 grid steps (megacore sharding on v7x)."""
  divisors = [d for d in range(1, B + 1) if B % d == 0]
  fitting = [d for d in divisors if step_bytes(d) <= budget]
  if fitting:
    reach = [d for d in fitting if d * S >= target_rows]
    Bt = min(reach) if reach else max(fitting)
  else:
    Bt = 1   # smallest possible tile; footprint estimate is conservative
  if B > 1 and B // Bt < 2:
    smaller = [d for d in divisors if d <= B // 2]
    if smaller:
      Bt = max(smaller)
  return Bt


def _encoder_block_impl(x, params, *, num_heads, attn_features, eps,
                        compute_dtype, batched_heads, single_buffer_params):
  B, S, D = x.shape
  H, A = num_heads, attn_features
  HA = H * A
  F = params["w1"].shape[1]
  cdt = jnp.dtype(compute_dtype)
  inv_norm = 1.0 / math.sqrt(float(A))

  # ---- Fuse per-head Q/K/V weights into one (D, 3*H*A) matmul operand; fold
  #      the 1/sqrt(A) softmax scale into the q columns. ----
  def flat_w(w):   # (H, D, A) -> (D, H*A), column index = h*A + a
    return jnp.transpose(w, (1, 0, 2)).reshape(D, HA)

  def flat_b(b):   # (H, 1, A) -> (1, H*A)
    return b.reshape(1, HA)

  wqkv = jnp.concatenate(
      [flat_w(params["wq"]) * inv_norm, flat_w(params["wk"]),
       flat_w(params["wv"])], axis=1).astype(cdt)
  bqkv = jnp.concatenate(
      [flat_b(params["bq"]) * inv_norm, flat_b(params["bk"]),
       flat_b(params["bv"])], axis=1).astype(jnp.float32)
  wp3 = params["wp"].reshape(H, A, D).astype(cdt)   # per-head projection blocks

  ordered = [
      wqkv, bqkv,
      wp3, params["bp"].astype(jnp.float32),
      params["g1"].astype(jnp.float32), params["beta1"].astype(jnp.float32),
      params["w1"].astype(cdt), params["b1"].astype(jnp.float32),
      params["w2"].astype(cdt), params["b2"].astype(jnp.float32),
      params["g2"].astype(jnp.float32), params["beta2"].astype(jnp.float32),
  ]

  # ---- Generation-aware VMEM budget and tile sizing. ----
  vmem_cap = _vmem_capacity_bytes()
  vmem_limit = max(32 * 1024 * 1024,
                   min(int(0.75 * vmem_cap), 100 * 1024 * 1024))
  param_buffers = 1 if single_buffer_params else 2
  param_bytes = sum(int(a.size) * a.dtype.itemsize for a in ordered) * param_buffers

  def step_bytes(Bt):
    M = Bt * S
    io = 2 * 2 * Bt * S * D * cdt.itemsize           # x & y tiles, double-buffered
    tmp = 4 * (M * 3 * HA                            # qkv (f32)
               + 2 * Bt * H * S * S                  # scores + probs (f32)
               + M * HA                              # head outputs (f32)
               + 3 * M * D                           # x1 / attn / x2 (f32)
               + M * F)                              # FFN hidden (f32)
    return io + tmp + param_bytes

  Bt = _choose_batch_tile(B, S, step_bytes, budget=int(0.8 * vmem_limit),
                          target_rows=512)
  grid = (B // Bt,)

  kernel = functools.partial(
      encoder_block_kernel, num_heads=H, attn_features=A, eps=eps,
      compute_dtype=cdt, batched_heads=batched_heads)

  def param_spec(a):
    nd = a.ndim
    idx = lambda b, _nd=nd: (0,) * _nd               # grid-invariant
    if single_buffer_params:
      return pl.BlockSpec(a.shape, idx, pipeline_mode=pl.Buffered(1))
    return pl.BlockSpec(a.shape, idx)

  in_specs = [pl.BlockSpec((Bt, S, D), lambda b: (b, 0, 0))]
  in_specs += [param_spec(a) for a in ordered]

  return pl.pallas_call(
      kernel,
      out_shape=jax.ShapeDtypeStruct((B, S, D), cdt),
      grid=grid,
      in_specs=in_specs,
      out_specs=pl.BlockSpec((Bt, S, D), lambda b: (b, 0, 0)),
      compiler_params=pltpu.CompilerParams(
          dimension_semantics=("parallel",),          # batch axis is independent
          vmem_limit_bytes=vmem_limit),
  )(x.astype(cdt), *ordered)


# Cache of the first (batched_heads, single_buffer_params) combination that
# lowers on this jax/TPU installation; later calls skip the probing.
_WORKING_CONFIG = None


def encoder_block(x, params, *, num_heads, attn_features, eps=1e-5,
                  compute_dtype=jnp.bfloat16):
  global _WORKING_CONFIG
  configs = ([_WORKING_CONFIG] if _WORKING_CONFIG is not None else
             [(True, True), (True, False), (False, True), (False, False)])
  last_err = None
  for batched_heads, single_buffer in configs:
    try:
      out = _encoder_block_impl(
          x, params, num_heads=num_heads, attn_features=attn_features, eps=eps,
          compute_dtype=compute_dtype, batched_heads=batched_heads,
          single_buffer_params=single_buffer)
      out = jax.block_until_ready(out)
      _WORKING_CONFIG = (batched_heads, single_buffer)
      return out
    except Exception as e:   # feature support varies across jax/TPU generations
      last_err = e
  raise last_err


def encoder_block_ref(x, params, *, num_heads, attn_features, eps=1e-5):
  """Pure-JAX reference matching the PyTorch forward (eval mode, f32)."""
  inv_norm = 1.0 / math.sqrt(float(attn_features))
  heads = []
  for h in range(num_heads):
    q = x @ params["wq"][h] + params["bq"][h]
    k = x @ params["wk"][h] + params["bk"][h]
    v = x @ params["wv"][h] + params["bv"][h]
    s = jnp.einsum("bqa,bka->bqk", q, k) * inv_norm
    p = jax.nn.softmax(s, axis=-1)
    heads.append(jnp.einsum("bqk,bka->bqa", p, v))
  attn = jnp.concatenate(heads, axis=-1) @ params["wp"] + params["bp"][0]
  x1 = x + attn
  mu = jnp.mean(x1, axis=-1, keepdims=True)
  var = jnp.mean((x1 - mu) ** 2, axis=-1, keepdims=True)
  x1 = (x1 - mu) / jnp.sqrt(var + eps) * params["g1"][0] + params["beta1"][0]
  h1 = jnp.maximum(x1 @ params["w1"] + params["b1"][0], 0.0)
  ffn = h1 @ params["w2"] + params["b2"][0]
  x2 = x1 + ffn
  mu2 = jnp.mean(x2, axis=-1, keepdims=True)
  var2 = jnp.mean((x2 - mu2) ** 2, axis=-1, keepdims=True)
  return (x2 - mu2) / jnp.sqrt(var2 + eps) * params["g2"][0] + params["beta2"][0]


def init_params(key, *, in_features, attn_features, attn_num_heads, ffn_features):
  D, A, H, F = in_features, attn_features, attn_num_heads, ffn_features
  ks = jax.random.split(key, 16)
  n = lambda k, shape, scale: (scale * jax.random.normal(k, shape)).astype(jnp.float32)
  return {
      # stacked per-head Q/K/V projections
      "wq": n(ks[0], (H, D, A), 0.1), "bq": n(ks[1], (H, 1, A), 0.1),
      "wk": n(ks[2], (H, D, A), 0.1), "bk": n(ks[3], (H, 1, A), 0.1),
      "wv": n(ks[4], (H, D, A), 0.1), "bv": n(ks[5], (H, 1, A), 0.1),
      # output projection of MultiHeadAttention
      "wp": n(ks[6], (H * A, D), 0.1), "bp": n(ks[7], (1, D), 0.1),
      # LayerNorm after attention (torch default: gamma=1, beta=0)
      "g1": jnp.ones((1, D), jnp.float32), "beta1": jnp.zeros((1, D), jnp.float32),
      # FFN
      "w1": n(ks[8], (D, F), 0.1), "b1": n(ks[9], (1, F), 0.1),
      "w2": n(ks[10], (F, D), 0.1), "b2": n(ks[11], (1, D), 0.1),
      # LayerNorm after FFN
      "g2": jnp.ones((1, D), jnp.float32), "beta2": jnp.zeros((1, D), jnp.float32),
  }


if __name__ == "__main__":
  B, S = 2, 8
  in_features, attn_features, attn_num_heads, ffn_features = 32, 16, 2, 64

  key = jax.random.PRNGKey(0)
  kx, kp = jax.random.split(key)
  x = jax.random.normal(kx, (B, S, in_features), dtype=jnp.float32)
  params = init_params(kp, in_features=in_features, attn_features=attn_features,
                       attn_num_heads=attn_num_heads, ffn_features=ffn_features)

  ref = encoder_block_ref(x, params, num_heads=attn_num_heads,
                          attn_features=attn_features)

  # f32 compute/IO path: tight agreement with the reference.
  out_f32 = encoder_block(x, params, num_heads=attn_num_heads,
                          attn_features=attn_features,
                          compute_dtype=jnp.float32)
  out_f32 = jax.block_until_ready(out_f32)
  np.testing.assert_allclose(np.asarray(out_f32), np.asarray(ref),
                             atol=1e-4, rtol=1e-4)

  # bf16 compute/IO path (default / fast): bf16 streaming + MXU operands,
  # f32 accumulation and LayerNorm statistics.
  out_bf16 = encoder_block(x, params, num_heads=attn_num_heads,
                           attn_features=attn_features,
                           compute_dtype=jnp.bfloat16)
  out_bf16 = jax.block_until_ready(out_bf16)
  np.testing.assert_allclose(np.asarray(out_bf16.astype(jnp.float32)),
                             np.asarray(ref), atol=5e-2, rtol=5e-2)

  print("KERNEL_OK")
</pallas_src>

<mosaic_0001>
module attributes {stable_mosaic.version = 11 : i64} {
  func.func @encoder_block_kernel(%arg0: i32, %arg1: memref<1x8x32xf32, #tpu.memory_space<vmem>>, %arg2: memref<32x96xf32, #tpu.memory_space<vmem>>, %arg3: memref<1x96xf32, #tpu.memory_space<vmem>>, %arg4: memref<2x16x32xf32, #tpu.memory_space<vmem>>, %arg5: memref<1x32xf32, #tpu.memory_space<vmem>>, %arg6: memref<1x32xf32, #tpu.memory_space<vmem>>, %arg7: memref<1x32xf32, #tpu.memory_space<vmem>>, %arg8: memref<32x64xf32, #tpu.memory_space<vmem>>, %arg9: memref<1x64xf32, #tpu.memory_space<vmem>>, %arg10: memref<64x32xf32, #tpu.memory_space<vmem>>, %arg11: memref<1x32xf32, #tpu.memory_space<vmem>>, %arg12: memref<1x32xf32, #tpu.memory_space<vmem>>, %arg13: memref<1x32xf32, #tpu.memory_space<vmem>>, %arg14: memref<1x8x32xf32, #tpu.memory_space<vmem>>) attributes {dimension_semantics = [#tpu.dimension_semantics<parallel>], iteration_bounds = array<i64: 2>, scalar_prefetch = 0 : i64, scratch_operands = 0 : i64, tpu.core_type = #tpu.core_type<tc>, window_params = [{transform_indices = @transform_0, window_bounds = array<i64: 1, 8, 32>}, {pipeline_mode = #tpu.pipeline_mode<synchronous>, transform_indices = @transform_1, window_bounds = array<i64: 32, 96>}, {pipeline_mode = #tpu.pipeline_mode<synchronous>, transform_indices = @transform_2, window_bounds = array<i64: 1, 96>}, {pipeline_mode = #tpu.pipeline_mode<synchronous>, transform_indices = @transform_3, window_bounds = array<i64: 2, 16, 32>}, {pipeline_mode = #tpu.pipeline_mode<synchronous>, transform_indices = @transform_4, window_bounds = array<i64: 1, 32>}, {pipeline_mode = #tpu.pipeline_mode<synchronous>, transform_indices = @transform_5, window_bounds = array<i64: 1, 32>}, {pipeline_mode = #tpu.pipeline_mode<synchronous>, transform_indices = @transform_6, window_bounds = array<i64: 1, 32>}, {pipeline_mode = #tpu.pipeline_mode<synchronous>, transform_indices = @transform_7, window_bounds = array<i64: 32, 64>}, {pipeline_mode = #tpu.pipeline_mode<synchronous>, transform_indices = @transform_8, window_bounds = array<i64: 1, 64>}, {pipeline_mode = #tpu.pipeline_mode<synchronous>, transform_indices = @transform_9, window_bounds = array<i64: 64, 32>}, {pipeline_mode = #tpu.pipeline_mode<synchronous>, transform_indices = @transform_10, window_bounds = array<i64: 1, 32>}, {pipeline_mode = #tpu.pipeline_mode<synchronous>, transform_indices = @transform_11, window_bounds = array<i64: 1, 32>}, {pipeline_mode = #tpu.pipeline_mode<synchronous>, transform_indices = @transform_12, window_bounds = array<i64: 1, 32>}, {transform_indices = @transform_13, window_bounds = array<i64: 1, 8, 32>}]} {
    %c0 = arith.constant 0 : index
    %c0_0 = arith.constant 0 : index
    %c0_1 = arith.constant 0 : index
    %0 = vector.load %arg1[%c0, %c0_0, %c0_1] : memref<1x8x32xf32, #tpu.memory_space<vmem>>, vector<1x8x32xf32>
    %1 = vector.shape_cast %0 : vector<1x8x32xf32> to vector<8x32xf32>
    %c0_2 = arith.constant 0 : index
    %c0_3 = arith.constant 0 : index
    %2 = vector.load %arg2[%c0_2, %c0_3] : memref<32x96xf32, #tpu.memory_space<vmem>>, vector<32x96xf32>
    %cst = arith.constant dense<0.000000e+00> : vector<8x96xf32>
    %3 = tpu.matmul %1, %2, %cst {dimension_numbers = #tpu.dot_dimension_numbers<[1], [0], [0], [1], [0, 0, 1, 1], [], []>} : vector<8x32xf32>, vector<32x96xf32>, vector<8x96xf32> -> vector<8x96xf32>
    %c0_4 = arith.constant 0 : index
    %c0_5 = arith.constant 0 : index
    %4 = vector.load %arg3[%c0_4, %c0_5] : memref<1x96xf32, #tpu.memory_space<vmem>>, vector<1x96xf32>
    %5 = vector.broadcast %4 : vector<1x96xf32> to vector<8x96xf32>
    %6 = arith.addf %3, %5 : vector<8x96xf32>
    %7 = vector.extract_strided_slice %6 {offsets = [0, 0], sizes = [8, 16], strides = [1, 1]} : vector<8x96xf32> to vector<8x16xf32>
    %8 = vector.shape_cast %7 : vector<8x16xf32> to vector<1x8x16xf32>
    %9 = vector.extract_strided_slice %6 {offsets = [0, 32], sizes = [8, 16], strides = [1, 1]} : vector<8x96xf32> to vector<8x16xf32>
    %10 = vector.shape_cast %9 : vector<8x16xf32> to vector<1x8x16xf32>
    %11 = vector.extract_strided_slice %6 {offsets = [0, 64], sizes = [8, 16], strides = [1, 1]} : vector<8x96xf32> to vector<8x16xf32>
    %12 = vector.shape_cast %11 : vector<8x16xf32> to vector<1x8x16xf32>
    "tpu.trace_start"() <{level = 10 : i32, message = "bqa,bka->bqk"}> : () -> ()
    %cst_6 = arith.constant dense<0.000000e+00> : vector<1x8x8xf32>
    %13 = tpu.matmul %8, %10, %cst_6 {dimension_numbers = #tpu.dot_dimension_numbers<[2], [2], [1], [1], [0, 0, 0, 1, 1, 1], [0], [0]>} : vector<1x8x16xf32>, vector<1x8x16xf32>, vector<1x8x8xf32> -> vector<1x8x8xf32>
    "tpu.trace_stop"() : () -> ()
    %cst_7 = arith.constant dense<0xFF800000> : vector<1x8xf32>
    %14 = vector.multi_reduction <maximumf>, %13, %cst_7 [2] : vector<1x8x8xf32> to vector<1x8xf32>
    %15 = vector.shape_cast %14 : vector<1x8xf32> to vector<1x8x1xf32>
    %16 = vector.broadcast %15 : vector<1x8x1xf32> to vector<1x8x8xf32>
    %17 = arith.subf %13, %16 : vector<1x8x8xf32>
    %18 = math.exp %17 : vector<1x8x8xf32>
    %cst_8 = arith.constant dense<0.000000e+00> : vector<1x8xf32>
    %19 = vector.multi_reduction <add>, %18, %cst_8 [2] : vector<1x8x8xf32> to vector<1x8xf32>
    %20 = vector.shape_cast %19 : vector<1x8xf32> to vector<1x8x1xf32>
    %21 = tpu.reciprocal %20 : vector<1x8x1xf32> -> vector<1x8x1xf32>
    %22 = vector.broadcast %21 : vector<1x8x1xf32> to vector<1x8x8xf32>
    %23 = arith.mulf %18, %22 : vector<1x8x8xf32>
    "tpu.trace_start"() <{level = 10 : i32, message = "bqk,bka->bqa"}> : () -> ()
    %cst_9 = arith.constant dense<0.000000e+00> : vector<1x8x16xf32>
    %24 = tpu.matmul %23, %12, %cst_9 {dimension_numbers = #tpu.dot_dimension_numbers<[2], [1], [1], [2], [0, 0, 0, 1, 1, 2], [0], [0]>} : vector<1x8x8xf32>, vector<1x8x16xf32>, vector<1x8x16xf32> -> vector<1x8x16xf32>
    "tpu.trace_stop"() : () -> ()
    %25 = vector.shape_cast %24 : vector<1x8x16xf32> to vector<8x16xf32>
    %c0_10 = arith.constant 0 : index
    %c0_11 = arith.constant 0 : index
    %c0_12 = arith.constant 0 : index
    %26 = vector.load %arg4[%c0_10, %c0_11, %c0_12] : memref<2x16x32xf32, #tpu.memory_space<vmem>>, vector<1x16x32xf32>
    %27 = vector.shape_cast %26 : vector<1x16x32xf32> to vector<16x32xf32>
    %cst_13 = arith.constant dense<0.000000e+00> : vector<8x32xf32>
    %28 = tpu.matmul %25, %27, %cst_13 {dimension_numbers = #tpu.dot_dimension_numbers<[1], [0], [0], [1], [0, 0, 1, 1], [], []>} : vector<8x16xf32>, vector<16x32xf32>, vector<8x32xf32> -> vector<8x32xf32>
    %29 = vector.extract_strided_slice %6 {offsets = [0, 16], sizes = [8, 16], strides = [1, 1]} : vector<8x96xf32> to vector<8x16xf32>
    %30 = vector.shape_cast %29 : vector<8x16xf32> to vector<1x8x16xf32>
    %31 = vector.extract_strided_slice %6 {offsets = [0, 48], sizes = [8, 16], strides = [1, 1]} : vector<8x96xf32> to vector<8x16xf32>
    %32 = vector.shape_cast %31 : vector<8x16xf32> to vector<1x8x16xf32>
    %33 = vector.extract_strided_slice %6 {offsets = [0, 80], sizes = [8, 16], strides = [1, 1]} : vector<8x96xf32> to vector<8x16xf32>
    %34 = vector.shape_cast %33 : vector<8x16xf32> to vector<1x8x16xf32>
    "tpu.trace_start"() <{level = 10 : i32, message = "bqa,bka->bqk"}> : () -> ()
    %cst_14 = arith.constant dense<0.000000e+00> : vector<1x8x8xf32>
    %35 = tpu.matmul %30, %32, %cst_14 {dimension_numbers = #tpu.dot_dimension_numbers<[2], [2], [1], [1], [0, 0, 0, 1, 1, 1], [0], [0]>} : vector<1x8x16xf32>, vector<1x8x16xf32>, vector<1x8x8xf32> -> vector<1x8x8xf32>
    "tpu.trace_stop"() : () -> ()
    %cst_15 = arith.constant dense<0xFF800000> : vector<1x8xf32>
    %36 = vector.multi_reduction <maximumf>, %35, %cst_15 [2] : vector<1x8x8xf32> to vector<1x8xf32>
    %37 = vector.shape_cast %36 : vector<1x8xf32> to vector<1x8x1xf32>
    %38 = vector.broadcast %37 : vector<1x8x1xf32> to vector<1x8x8xf32>
    %39 = arith.subf %35, %38 : vector<1x8x8xf32>
    %40 = math.exp %39 : vector<1x8x8xf32>
    %cst_16 = arith.constant dense<0.000000e+00> : vector<1x8xf32>
    %41 = vector.multi_reduction <add>, %40, %cst_16 [2] : vector<1x8x8xf32> to vector<1x8xf32>
    %42 = vector.shape_cast %41 : vector<1x8xf32> to vector<1x8x1xf32>
    %43 = tpu.reciprocal %42 : vector<1x8x1xf32> -> vector<1x8x1xf32>
    %44 = vector.broadcast %43 : vector<1x8x1xf32> to vector<1x8x8xf32>
    %45 = arith.mulf %40, %44 : vector<1x8x8xf32>
    "tpu.trace_start"() <{level = 10 : i32, message = "bqk,bka->bqa"}> : () -> ()
    %cst_17 = arith.constant dense<0.000000e+00> : vector<1x8x16xf32>
    %46 = tpu.matmul %45, %34, %cst_17 {dimension_numbers = #tpu.dot_dimension_numbers<[2], [1], [1], [2], [0, 0, 0, 1, 1, 2], [0], [0]>} : vector<1x8x8xf32>, vector<1x8x16xf32>, vector<1x8x16xf32> -> vector<1x8x16xf32>
    "tpu.trace_stop"() : () -> ()
    %47 = vector.shape_cast %46 : vector<1x8x16xf32> to vector<8x16xf32>
    %c1 = arith.constant 1 : index
    %c0_18 = arith.constant 0 : index
    %c0_19 = arith.constant 0 : index
    %48 = vector.load %arg4[%c1, %c0_18, %c0_19] : memref<2x16x32xf32, #tpu.memory_space<vmem>>, vector<1x16x32xf32>
    %49 = vector.shape_cast %48 : vector<1x16x32xf32> to vector<16x32xf32>
    %cst_20 = arith.constant dense<0.000000e+00> : vector<8x32xf32>
    %50 = tpu.matmul %47, %49, %cst_20 {dimension_numbers = #tpu.dot_dimension_numbers<[1], [0], [0], [1], [0, 0, 1, 1], [], []>} : vector<8x16xf32>, vector<16x32xf32>, vector<8x32xf32> -> vector<8x32xf32>
    %51 = arith.addf %28, %50 : vector<8x32xf32>
    %c0_21 = arith.constant 0 : index
    %c0_22 = arith.constant 0 : index
    %52 = vector.load %arg5[%c0_21, %c0_22] : memref<1x32xf32, #tpu.memory_space<vmem>>, vector<1x32xf32>
    %53 = vector.broadcast %52 : vector<1x32xf32> to vector<8x32xf32>
    %54 = arith.addf %51, %53 : vector<8x32xf32>
    %55 = arith.addf %1, %54 : vector<8x32xf32>
    %cst_23 = arith.constant dense<0.000000e+00> : vector<8xf32>
    %56 = vector.multi_reduction <add>, %55, %cst_23 [1] : vector<8x32xf32> to vector<8xf32>
    %57 = vector.shape_cast %56 : vector<8xf32> to vector<8x1xf32>
    %cst_24 = arith.constant 3.200000e+01 : f32
    %58 = vector.broadcast %cst_24 : f32 to vector<8x1xf32>
    %59 = arith.divf %57, %58 : vector<8x1xf32>
    %60 = vector.broadcast %59 : vector<8x1xf32> to vector<8x32xf32>
    %61 = arith.subf %55, %60 : vector<8x32xf32>
    %62 = arith.mulf %61, %61 : vector<8x32xf32>
    %cst_25 = arith.constant dense<0.000000e+00> : vector<8xf32>
    %63 = vector.multi_reduction <add>, %62, %cst_25 [1] : vector<8x32xf32> to vector<8xf32>
    %64 = vector.shape_cast %63 : vector<8xf32> to vector<8x1xf32>
    %cst_26 = arith.constant 3.200000e+01 : f32
    %65 = vector.broadcast %cst_26 : f32 to vector<8x1xf32>
    %66 = arith.divf %64, %65 : vector<8x1xf32>
    %67 = vector.broadcast %59 : vector<8x1xf32> to vector<8x32xf32>
    %68 = arith.subf %55, %67 : vector<8x32xf32>
    %cst_27 = arith.constant 9.99999974E-6 : f32
    %69 = vector.broadcast %cst_27 : f32 to vector<8x1xf32>
    %70 = arith.addf %66, %69 : vector<8x1xf32>
    %71 = math.rsqrt %70 : vector<8x1xf32>
    %72 = vector.broadcast %71 : vector<8x1xf32> to vector<8x32xf32>
    %73 = arith.mulf %68, %72 : vector<8x32xf32>
    %c0_28 = arith.constant 0 : index
    %c0_29 = arith.constant 0 : index
    %74 = vector.load %arg6[%c0_28, %c0_29] : memref<1x32xf32, #tpu.memory_space<vmem>>, vector<1x32xf32>
    %75 = vector.broadcast %74 : vector<1x32xf32> to vector<8x32xf32>
    %76 = arith.mulf %73, %75 : vector<8x32xf32>
    %c0_30 = arith.constant 0 : index
    %c0_31 = arith.constant 0 : index
    %77 = vector.load %arg7[%c0_30, %c0_31] : memref<1x32xf32, #tpu.memory_space<vmem>>, vector<1x32xf32>
    %78 = vector.broadcast %77 : vector<1x32xf32> to vector<8x32xf32>
    %79 = arith.addf %76, %78 : vector<8x32xf32>
    %c0_32 = arith.constant 0 : index
    %c0_33 = arith.constant 0 : index
    %80 = vector.load %arg8[%c0_32, %c0_33] : memref<32x64xf32, #tpu.memory_space<vmem>>, vector<32x64xf32>
    %cst_34 = arith.constant dense<0.000000e+00> : vector<8x64xf32>
    %81 = tpu.matmul %79, %80, %cst_34 {dimension_numbers = #tpu.dot_dimension_numbers<[1], [0], [0], [1], [0, 0, 1, 1], [], []>} : vector<8x32xf32>, vector<32x64xf32>, vector<8x64xf32> -> vector<8x64xf32>
    %c0_35 = arith.constant 0 : index
    %c0_36 = arith.constant 0 : index
    %82 = vector.load %arg9[%c0_35, %c0_36] : memref<1x64xf32, #tpu.memory_space<vmem>>, vector<1x64xf32>
    %83 = vector.broadcast %82 : vector<1x64xf32> to vector<8x64xf32>
    %84 = arith.addf %81, %83 : vector<8x64xf32>
    %cst_37 = arith.constant 0.000000e+00 : f32
    %85 = vector.broadcast %cst_37 : f32 to vector<8x64xf32>
    %86 = arith.maximumf %84, %85 : vector<8x64xf32>
    %c0_38 = arith.constant 0 : index
    %c0_39 = arith.constant 0 : index
    %87 = vector.load %arg10[%c0_38, %c0_39] : memref<64x32xf32, #tpu.memory_space<vmem>>, vector<64x32xf32>
    %cst_40 = arith.constant dense<0.000000e+00> : vector<8x32xf32>
    %88 = tpu.matmul %86, %87, %cst_40 {dimension_numbers = #tpu.dot_dimension_numbers<[1], [0], [0], [1], [0, 0, 1, 1], [], []>} : vector<8x64xf32>, vector<64x32xf32>, vector<8x32xf32> -> vector<8x32xf32>
    %c0_41 = arith.constant 0 : index
    %c0_42 = arith.constant 0 : index
    %89 = vector.load %arg11[%c0_41, %c0_42] : memref<1x32xf32, #tpu.memory_space<vmem>>, vector<1x32xf32>
    %90 = vector.broadcast %89 : vector<1x32xf32> to vector<8x32xf32>
    %91 = arith.addf %88, %90 : vector<8x32xf32>
    %92 = arith.addf %79, %91 : vector<8x32xf32>
    %cst_43 = arith.constant dense<0.000000e+00> : vector<8xf32>
    %93 = vector.multi_reduction <add>, %92, %cst_43 [1] : vector<8x32xf32> to vector<8xf32>
    %94 = vector.shape_cast %93 : vector<8xf32> to vector<8x1xf32>
    %cst_44 = arith.constant 3.200000e+01 : f32
    %95 = vector.broadcast %cst_44 : f32 to vector<8x1xf32>
    %96 = arith.divf %94, %95 : vector<8x1xf32>
    %97 = vector.broadcast %96 : vector<8x1xf32> to vector<8x32xf32>
    %98 = arith.subf %92, %97 : vector<8x32xf32>
    %99 = arith.mulf %98, %98 : vector<8x32xf32>
    %cst_45 = arith.constant dense<0.000000e+00> : vector<8xf32>
    %100 = vector.multi_reduction <add>, %99, %cst_45 [1] : vector<8x32xf32> to vector<8xf32>
    %101 = vector.shape_cast %100 : vector<8xf32> to vector<8x1xf32>
    %cst_46 = arith.constant 3.200000e+01 : f32
    %102 = vector.broadcast %cst_46 : f32 to vector<8x1xf32>
    %103 = arith.divf %101, %102 : vector<8x1xf32>
    %104 = vector.broadcast %96 : vector<8x1xf32> to vector<8x32xf32>
    %105 = arith.subf %92, %104 : vector<8x32xf32>
    %cst_47 = arith.constant 9.99999974E-6 : f32
    %106 = vector.broadcast %cst_47 : f32 to vector<8x1xf32>
    %107 = arith.addf %103, %106 : vector<8x1xf32>
    %108 = math.rsqrt %107 : vector<8x1xf32>
    %109 = vector.broadcast %108 : vector<8x1xf32> to vector<8x32xf32>
    %110 = arith.mulf %105, %109 : vector<8x32xf32>
    %c0_48 = arith.constant 0 : index
    %c0_49 = arith.constant 0 : index
    %111 = vector.load %arg12[%c0_48, %c0_49] : memref<1x32xf32, #tpu.memory_space<vmem>>, vector<1x32xf32>
    %112 = vector.broadcast %111 : vector<1x32xf32> to vector<8x32xf32>
    %113 = arith.mulf %110, %112 : vector<8x32xf32>
    %c0_50 = arith.constant 0 : index
    %c0_51 = arith.constant 0 : index
    %114 = vector.load %arg13[%c0_50, %c0_51] : memref<1x32xf32, #tpu.memory_space<vmem>>, vector<1x32xf32>
    %115 = vector.broadcast %114 : vector<1x32xf32> to vector<8x32xf32>
    %116 = arith.addf %113, %115 : vector<8x32xf32>
    %117 = vector.shape_cast %116 : vector<8x32xf32> to vector<1x8x32xf32>
    %c0_52 = arith.constant 0 : index
    %c0_53 = arith.constant 0 : index
    %c0_54 = arith.constant 0 : index
    %118 = vector.load %arg14[%c0_52, %c0_53, %c0_54] : memref<1x8x32xf32, #tpu.memory_space<vmem>>, vector<1x8x32xf32>
    tpu.vector_store %arg14[%c0_52, %c0_53, %c0_54], %117 {strides = array<i32>} : memref<1x8x32xf32, #tpu.memory_space<vmem>>, vector<1x8x32xf32>,
    return
  }
  func.func @transform_0(%arg0: i32) -> (i32, i32, i32) {
    %c0_i32 = arith.constant 0 : i32
    %c0_i32_0 = arith.constant 0 : i32
    %c0_i32_1 = arith.constant 0 : i32
    return %arg0, %c0_i32, %c0_i32_0 : i32, i32, i32
  }
  func.func @transform_1(%arg0: i32) -> (i32, i32) {
    %c0_i32 = arith.constant 0 : i32
    %c0_i32_0 = arith.constant 0 : i32
    %c0_i32_1 = arith.constant 0 : i32
    return %c0_i32, %c0_i32_0 : i32, i32
  }
  func.func @transform_2(%arg0: i32) -> (i32, i32) {
    %c0_i32 = arith.constant 0 : i32
    %c0_i32_0 = arith.constant 0 : i32
    %c0_i32_1 = arith.constant 0 : i32
    return %c0_i32, %c0_i32_0 : i32, i32
  }
  func.func @transform_3(%arg0: i32) -> (i32, i32, i32) {
    %c0_i32 = arith.constant 0 : i32
    %c0_i32_0 = arith.constant 0 : i32
    %c0_i32_1 = arith.constant 0 : i32
    %c0_i32_2 = arith.constant 0 : i32
    return %c0_i32, %c0_i32_0, %c0_i32_1 : i32, i32, i32
  }
  func.func @transform_4(%arg0: i32) -> (i32, i32) {
    %c0_i32 = arith.constant 0 : i32
    %c0_i32_0 = arith.constant 0 : i32
    %c0_i32_1 = arith.constant 0 : i32
    return %c0_i32, %c0_i32_0 : i32, i32
  }
  func.func @transform_5(%arg0: i32) -> (i32, i32) {
    %c0_i32 = arith.constant 0 : i32
    %c0_i32_0 = arith.constant 0 : i32
    %c0_i32_1 = arith.constant 0 : i32
    return %c0_i32, %c0_i32_0 : i32, i32
  }
  func.func @transform_6(%arg0: i32) -> (i32, i32) {
    %c0_i32 = arith.constant 0 : i32
    %c0_i32_0 = arith.constant 0 : i32
    %c0_i32_1 = arith.constant 0 : i32
    return %c0_i32, %c0_i32_0 : i32, i32
  }
  func.func @transform_7(%arg0: i32) -> (i32, i32) {
    %c0_i32 = arith.constant 0 : i32
    %c0_i32_0 = arith.constant 0 : i32
    %c0_i32_1 = arith.constant 0 : i32
    return %c0_i32, %c0_i32_0 : i32, i32
  }
  func.func @transform_8(%arg0: i32) -> (i32, i32) {
    %c0_i32 = arith.constant 0 : i32
    %c0_i32_0 = arith.constant 0 : i32
    %c0_i32_1 = arith.constant 0 : i32
    return %c0_i32, %c0_i32_0 : i32, i32
  }
  func.func @transform_9(%arg0: i32) -> (i32, i32) {
    %c0_i32 = arith.constant 0 : i32
    %c0_i32_0 = arith.constant 0 : i32
    %c0_i32_1 = arith.constant 0 : i32
    return %c0_i32, %c0_i32_0 : i32, i32
  }
  func.func @transform_10(%arg0: i32) -> (i32, i32) {
    %c0_i32 = arith.constant 0 : i32
    %c0_i32_0 = arith.constant 0 : i32
    %c0_i32_1 = arith.constant 0 : i32
    return %c0_i32, %c0_i32_0 : i32, i32
  }
  func.func @transform_11(%arg0: i32) -> (i32, i32) {
    %c0_i32 = arith.constant 0 : i32
    %c0_i32_0 = arith.constant 0 : i32
    %c0_i32_1 = arith.constant 0 : i32
    return %c0_i32, %c0_i32_0 : i32, i32
  }
  func.func @transform_12(%arg0: i32) -> (i32, i32) {
    %c0_i32 = arith.constant 0 : i32
    %c0_i32_0 = arith.constant 0 : i32
    %c0_i32_1 = arith.constant 0 : i32
    return %c0_i32, %c0_i32_0 : i32, i32
  }
  func.func @transform_13(%arg0: i32) -> (i32, i32, i32) {
    %c0_i32 = arith.constant 0 : i32
    %c0_i32_0 = arith.constant 0 : i32
    %c0_i32_1 = arith.constant 0 : i32
    return %arg0, %c0_i32, %c0_i32_0 : i32, i32, i32
  }
}

module attributes {stable_mosaic.version = 11 : i64} {
  func.func @encoder_block_kernel(%arg0: i32, %arg1: memref<1x8x32xf32, #tpu.memory_space<vmem>>, %arg2: memref<32x96xf32, #tpu.memory_space<vmem>>, %arg3: memref<1x96xf32, #tpu.memory_space<vmem>>, %arg4: memref<2x16x32xf32, #tpu.memory_space<vmem>>, %arg5: memref<1x32xf32, #tpu.memory_space<vmem>>, %arg6: memref<1x32xf32, #tpu.memory_space<vmem>>, %arg7: memref<1x32xf32, #tpu.memory_space<vmem>>, %arg8: memref<32x64xf32, #tpu.memory_space<vmem>>, %arg9: memref<1x64xf32, #tpu.memory_space<vmem>>, %arg10: memref<64x32xf32, #tpu.memory_space<vmem>>, %arg11: memref<1x32xf32, #tpu.memory_space<vmem>>, %arg12: memref<1x32xf32, #tpu.memory_space<vmem>>, %arg13: memref<1x32xf32, #tpu.memory_space<vmem>>, %arg14: memref<1x8x32xf32, #tpu.memory_space<vmem>>) attributes {dimension_semantics = [#tpu.dimension_semantics<parallel>], iteration_bounds = array<i64: 2>, scalar_prefetch = 0 : i64, scratch_operands = 0 : i64, tpu.core_type = #tpu.core_type<tc>, window_params = [{transform_indices = @transform_0, window_bounds = array<i64: 1, 8, 32>}, {pipeline_mode = #tpu.pipeline_mode<synchronous>, transform_indices = @transform_1, window_bounds = array<i64: 32, 96>}, {pipeline_mode = #tpu.pipeline_mode<synchronous>, transform_indices = @transform_2, window_bounds = array<i64: 1, 96>}, {pipeline_mode = #tpu.pipeline_mode<synchronous>, transform_indices = @transform_3, window_bounds = array<i64: 2, 16, 32>}, {pipeline_mode = #tpu.pipeline_mode<synchronous>, transform_indices = @transform_4, window_bounds = array<i64: 1, 32>}, {pipeline_mode = #tpu.pipeline_mode<synchronous>, transform_indices = @transform_5, window_bounds = array<i64: 1, 32>}, {pipeline_mode = #tpu.pipeline_mode<synchronous>, transform_indices = @transform_6, window_bounds = array<i64: 1, 32>}, {pipeline_mode = #tpu.pipeline_mode<synchronous>, transform_indices = @transform_7, window_bounds = array<i64: 32, 64>}, {pipeline_mode = #tpu.pipeline_mode<synchronous>, transform_indices = @transform_8, window_bounds = array<i64: 1, 64>}, {pipeline_mode = #tpu.pipeline_mode<synchronous>, transform_indices = @transform_9, window_bounds = array<i64: 64, 32>}, {pipeline_mode = #tpu.pipeline_mode<synchronous>, transform_indices = @transform_10, window_bounds = array<i64: 1, 32>}, {pipeline_mode = #tpu.pipeline_mode<synchronous>, transform_indices = @transform_11, window_bounds = array<i64: 1, 32>}, {pipeline_mode = #tpu.pipeline_mode<synchronous>, transform_indices = @transform_12, window_bounds = array<i64: 1, 32>}, {transform_indices = @transform_13, window_bounds = array<i64: 1, 8, 32>}]} {
    %c0 = arith.constant 0 : index
    %c0_0 = arith.constant 0 : index
    %c0_1 = arith.constant 0 : index
    %0 = vector.load %arg1[%c0, %c0_0, %c0_1] : memref<1x8x32xf32, #tpu.memory_space<vmem>>, vector<1x8x32xf32>
    %1 = vector.shape_cast %0 : vector<1x8x32xf32> to vector<8x32xf32>
    %c0_2 = arith.constant 0 : index
    %c0_3 = arith.constant 0 : index
    %2 = vector.load %arg2[%c0_2, %c0_3] : memref<32x96xf32, #tpu.memory_space<vmem>>, vector<32x96xf32>
    %cst = arith.constant dense<0.000000e+00> : vector<8x96xf32>
    %3 = tpu.matmul %1, %2, %cst {dimension_numbers = #tpu.dot_dimension_numbers<[1], [0], [0], [1], [0, 0, 1, 1], [], []>} : vector<8x32xf32>, vector<32x96xf32>, vector<8x96xf32> -> vector<8x96xf32>
    %c0_4 = arith.constant 0 : index
    %c0_5 = arith.constant 0 : index
    %4 = vector.load %arg3[%c0_4, %c0_5] : memref<1x96xf32, #tpu.memory_space<vmem>>, vector<1x96xf32>
    %5 = vector.broadcast %4 : vector<1x96xf32> to vector<8x96xf32>
    %6 = arith.addf %3, %5 : vector<8x96xf32>
    %7 = vector.extract_strided_slice %6 {offsets = [0, 0], sizes = [8, 16], strides = [1, 1]} : vector<8x96xf32> to vector<8x16xf32>
    %8 = vector.shape_cast %7 : vector<8x16xf32> to vector<1x8x16xf32>
    %9 = vector.extract_strided_slice %6 {offsets = [0, 32], sizes = [8, 16], strides = [1, 1]} : vector<8x96xf32> to vector<8x16xf32>
    %10 = vector.shape_cast %9 : vector<8x16xf32> to vector<1x8x16xf32>
    %11 = vector.extract_strided_slice %6 {offsets = [0, 64], sizes = [8, 16], strides = [1, 1]} : vector<8x96xf32> to vector<8x16xf32>
    %12 = vector.shape_cast %11 : vector<8x16xf32> to vector<1x8x16xf32>
    "tpu.trace_start"() <{level = 10 : i32, message = "bqa,bka->bqk"}> : () -> ()
    %cst_6 = arith.constant dense<0.000000e+00> : vector<1x8x8xf32>
    %13 = tpu.matmul %8, %10, %cst_6 {dimension_numbers = #tpu.dot_dimension_numbers<[2], [2], [1], [1], [0, 0, 0, 1, 1, 1], [0], [0]>} : vector<1x8x16xf32>, vector<1x8x16xf32>, vector<1x8x8xf32> -> vector<1x8x8xf32>
    "tpu.trace_stop"() : () -> ()
    %cst_7 = arith.constant dense<0xFF800000> : vector<1x8xf32>
    %14 = vector.multi_reduction <maximumf>, %13, %cst_7 [2] : vector<1x8x8xf32> to vector<1x8xf32>
    %15 = vector.shape_cast %14 : vector<1x8xf32> to vector<1x8x1xf32>
    %16 = vector.broadcast %15 : vector<1x8x1xf32> to vector<1x8x8xf32>
    %17 = arith.subf %13, %16 : vector<1x8x8xf32>
    %18 = math.exp %17 : vector<1x8x8xf32>
    %cst_8 = arith.constant dense<0.000000e+00> : vector<1x8xf32>
    %19 = vector.multi_reduction <add>, %18, %cst_8 [2] : vector<1x8x8xf32> to vector<1x8xf32>
    %20 = vector.shape_cast %19 : vector<1x8xf32> to vector<1x8x1xf32>
    %21 = tpu.reciprocal %20 : vector<1x8x1xf32> -> vector<1x8x1xf32>
    %22 = vector.broadcast %21 : vector<1x8x1xf32> to vector<1x8x8xf32>
    %23 = arith.mulf %18, %22 : vector<1x8x8xf32>
    "tpu.trace_start"() <{level = 10 : i32, message = "bqk,bka->bqa"}> : () -> ()
    %cst_9 = arith.constant dense<0.000000e+00> : vector<1x8x16xf32>
    %24 = tpu.matmul %23, %12, %cst_9 {dimension_numbers = #tpu.dot_dimension_numbers<[2], [1], [1], [2], [0, 0, 0, 1, 1, 2], [0], [0]>} : vector<1x8x8xf32>, vector<1x8x16xf32>, vector<1x8x16xf32> -> vector<1x8x16xf32>
    "tpu.trace_stop"() : () -> ()
    %25 = vector.shape_cast %24 : vector<1x8x16xf32> to vector<8x16xf32>
    %c0_10 = arith.constant 0 : index
    %c0_11 = arith.constant 0 : index
    %c0_12 = arith.constant 0 : index
    %26 = vector.load %arg4[%c0_10, %c0_11, %c0_12] : memref<2x16x32xf32, #tpu.memory_space<vmem>>, vector<1x16x32xf32>
    %27 = vector.shape_cast %26 : vector<1x16x32xf32> to vector<16x32xf32>
    %cst_13 = arith.constant dense<0.000000e+00> : vector<8x32xf32>
    %28 = tpu.matmul %25, %27, %cst_13 {dimension_numbers = #tpu.dot_dimension_numbers<[1], [0], [0], [1], [0, 0, 1, 1], [], []>} : vector<8x16xf32>, vector<16x32xf32>, vector<8x32xf32> -> vector<8x32xf32>
    %29 = vector.extract_strided_slice %6 {offsets = [0, 16], sizes = [8, 16], strides = [1, 1]} : vector<8x96xf32> to vector<8x16xf32>
    %30 = vector.shape_cast %29 : vector<8x16xf32> to vector<1x8x16xf32>
    %31 = vector.extract_strided_slice %6 {offsets = [0, 48], sizes = [8, 16], strides = [1, 1]} : vector<8x96xf32> to vector<8x16xf32>
    %32 = vector.shape_cast %31 : vector<8x16xf32> to vector<1x8x16xf32>
    %33 = vector.extract_strided_slice %6 {offsets = [0, 80], sizes = [8, 16], strides = [1, 1]} : vector<8x96xf32> to vector<8x16xf32>
    %34 = vector.shape_cast %33 : vector<8x16xf32> to vector<1x8x16xf32>
    "tpu.trace_start"() <{level = 10 : i32, message = "bqa,bka->bqk"}> : () -> ()
    %cst_14 = arith.constant dense<0.000000e+00> : vector<1x8x8xf32>
    %35 = tpu.matmul %30, %32, %cst_14 {dimension_numbers = #tpu.dot_dimension_numbers<[2], [2], [1], [1], [0, 0, 0, 1, 1, 1], [0], [0]>} : vector<1x8x16xf32>, vector<1x8x16xf32>, vector<1x8x8xf32> -> vector<1x8x8xf32>
    "tpu.trace_stop"() : () -> ()
    %cst_15 = arith.constant dense<0xFF800000> : vector<1x8xf32>
    %36 = vector.multi_reduction <maximumf>, %35, %cst_15 [2] : vector<1x8x8xf32> to vector<1x8xf32>
    %37 = vector.shape_cast %36 : vector<1x8xf32> to vector<1x8x1xf32>
    %38 = vector.broadcast %37 : vector<1x8x1xf32> to vector<1x8x8xf32>
    %39 = arith.subf %35, %38 : vector<1x8x8xf32>
    %40 = math.exp %39 : vector<1x8x8xf32>
    %cst_16 = arith.constant dense<0.000000e+00> : vector<1x8xf32>
    %41 = vector.multi_reduction <add>, %40, %cst_16 [2] : vector<1x8x8xf32> to vector<1x8xf32>
    %42 = vector.shape_cast %41 : vector<1x8xf32> to vector<1x8x1xf32>
    %43 = tpu.reciprocal %42 : vector<1x8x1xf32> -> vector<1x8x1xf32>
    %44 = vector.broadcast %43 : vector<1x8x1xf32> to vector<1x8x8xf32>
    %45 = arith.mulf %40, %44 : vector<1x8x8xf32>
    "tpu.trace_start"() <{level = 10 : i32, message = "bqk,bka->bqa"}> : () -> ()
    %cst_17 = arith.constant dense<0.000000e+00> : vector<1x8x16xf32>
    %46 = tpu.matmul %45, %34, %cst_17 {dimension_numbers = #tpu.dot_dimension_numbers<[2], [1], [1], [2], [0, 0, 0, 1, 1, 2], [0], [0]>} : vector<1x8x8xf32>, vector<1x8x16xf32>, vector<1x8x16xf32> -> vector<1x8x16xf32>
    "tpu.trace_stop"() : () -> ()
    %47 = vector.shape_cast %46 : vector<1x8x16xf32> to vector<8x16xf32>
    %c1 = arith.constant 1 : index
    %c0_18 = arith.constant 0 : index
    %c0_19 = arith.constant 0 : index
    %48 = vector.load %arg4[%c1, %c0_18, %c0_19] : memref<2x16x32xf32, #tpu.memory_space<vmem>>, vector<1x16x32xf32>
    %49 = vector.shape_cast %48 : vector<1x16x32xf32> to vector<16x32xf32>
    %cst_20 = arith.constant dense<0.000000e+00> : vector<8x32xf32>
    %50 = tpu.matmul %47, %49, %cst_20 {dimension_numbers = #tpu.dot_dimension_numbers<[1], [0], [0], [1], [0, 0, 1, 1], [], []>} : vector<8x16xf32>, vector<16x32xf32>, vector<8x32xf32> -> vector<8x32xf32>
    %51 = arith.addf %28, %50 : vector<8x32xf32>
    %c0_21 = arith.constant 0 : index
    %c0_22 = arith.constant 0 : index
    %52 = vector.load %arg5[%c0_21, %c0_22] : memref<1x32xf32, #tpu.memory_space<vmem>>, vector<1x32xf32>
    %53 = vector.broadcast %52 : vector<1x32xf32> to vector<8x32xf32>
    %54 = arith.addf %51, %53 : vector<8x32xf32>
    %55 = arith.addf %1, %54 : vector<8x32xf32>
    %cst_23 = arith.constant dense<0.000000e+00> : vector<8xf32>
    %56 = vector.multi_reduction <add>, %55, %cst_23 [1] : vector<8x32xf32> to vector<8xf32>
    %57 = vector.shape_cast %56 : vector<8xf32> to vector<8x1xf32>
    %cst_24 = arith.constant 3.200000e+01 : f32
    %58 = vector.broadcast %cst_24 : f32 to vector<8x1xf32>
    %59 = arith.divf %57, %58 : vector<8x1xf32>
    %60 = vector.broadcast %59 : vector<8x1xf32> to vector<8x32xf32>
    %61 = arith.subf %55, %60 : vector<8x32xf32>
    %62 = arith.mulf %61, %61 : vector<8x32xf32>
    %cst_25 = arith.constant dense<0.000000e+00> : vector<8xf32>
    %63 = vector.multi_reduction <add>, %62, %cst_25 [1] : vector<8x32xf32> to vector<8xf32>
    %64 = vector.shape_cast %63 : vector<8xf32> to vector<8x1xf32>
    %cst_26 = arith.constant 3.200000e+01 : f32
    %65 = vector.broadcast %cst_26 : f32 to vector<8x1xf32>
    %66 = arith.divf %64, %65 : vector<8x1xf32>
    %67 = vector.broadcast %59 : vector<8x1xf32> to vector<8x32xf32>
    %68 = arith.subf %55, %67 : vector<8x32xf32>
    %cst_27 = arith.constant 9.99999974E-6 : f32
    %69 = vector.broadcast %cst_27 : f32 to vector<8x1xf32>
    %70 = arith.addf %66, %69 : vector<8x1xf32>
    %71 = math.rsqrt %70 : vector<8x1xf32>
    %72 = vector.broadcast %71 : vector<8x1xf32> to vector<8x32xf32>
    %73 = arith.mulf %68, %72 : vector<8x32xf32>
    %c0_28 = arith.constant 0 : index
    %c0_29 = arith.constant 0 : index
    %74 = vector.load %arg6[%c0_28, %c0_29] : memref<1x32xf32, #tpu.memory_space<vmem>>, vector<1x32xf32>
    %75 = vector.broadcast %74 : vector<1x32xf32> to vector<8x32xf32>
    %76 = arith.mulf %73, %75 : vector<8x32xf32>
    %c0_30 = arith.constant 0 : index
    %c0_31 = arith.constant 0 : index
    %77 = vector.load %arg7[%c0_30, %c0_31] : memref<1x32xf32, #tpu.memory_space<vmem>>, vector<1x32xf32>
    %78 = vector.broadcast %77 : vector<1x32xf32> to vector<8x32xf32>
    %79 = arith.addf %76, %78 : vector<8x32xf32>
    %c0_32 = arith.constant 0 : index
    %c0_33 = arith.constant 0 : index
    %80 = vector.load %arg8[%c0_32, %c0_33] : memref<32x64xf32, #tpu.memory_space<vmem>>, vector<32x64xf32>
    %cst_34 = arith.constant dense<0.000000e+00> : vector<8x64xf32>
    %81 = tpu.matmul %79, %80, %cst_34 {dimension_numbers = #tpu.dot_dimension_numbers<[1], [0], [0], [1], [0, 0, 1, 1], [], []>} : vector<8x32xf32>, vector<32x64xf32>, vector<8x64xf32> -> vector<8x64xf32>
    %c0_35 = arith.constant 0 : index
    %c0_36 = arith.constant 0 : index
    %82 = vector.load %arg9[%c0_35, %c0_36] : memref<1x64xf32, #tpu.memory_space<vmem>>, vector<1x64xf32>
    %83 = vector.broadcast %82 : vector<1x64xf32> to vector<8x64xf32>
    %84 = arith.addf %81, %83 : vector<8x64xf32>
    %cst_37 = arith.constant 0.000000e+00 : f32
    %85 = vector.broadcast %cst_37 : f32 to vector<8x64xf32>
    %86 = arith.maximumf %84, %85 : vector<8x64xf32>
    %c0_38 = arith.constant 0 : index
    %c0_39 = arith.constant 0 : index
    %87 = vector.load %arg10[%c0_38, %c0_39] : memref<64x32xf32, #tpu.memory_space<vmem>>, vector<64x32xf32>
    %cst_40 = arith.constant dense<0.000000e+00> : vector<8x32xf32>
    %88 = tpu.matmul %86, %87, %cst_40 {dimension_numbers = #tpu.dot_dimension_numbers<[1], [0], [0], [1], [0, 0, 1, 1], [], []>} : vector<8x64xf32>, vector<64x32xf32>, vector<8x32xf32> -> vector<8x32xf32>
    %c0_41 = arith.constant 0 : index
    %c0_42 = arith.constant 0 : index
    %89 = vector.load %arg11[%c0_41, %c0_42] : memref<1x32xf32, #tpu.memory_space<vmem>>, vector<1x32xf32>
    %90 = vector.broadcast %89 : vector<1x32xf32> to vector<8x32xf32>
    %91 = arith.addf %88, %90 : vector<8x32xf32>
    %92 = arith.addf %79, %91 : vector<8x32xf32>
    %cst_43 = arith.constant dense<0.000000e+00> : vector<8xf32>
    %93 = vector.multi_reduction <add>, %92, %cst_43 [1] : vector<8x32xf32> to vector<8xf32>
    %94 = vector.shape_cast %93 : vector<8xf32> to vector<8x1xf32>
    %cst_44 = arith.constant 3.200000e+01 : f32
    %95 = vector.broadcast %cst_44 : f32 to vector<8x1xf32>
    %96 = arith.divf %94, %95 : vector<8x1xf32>
    %97 = vector.broadcast %96 : vector<8x1xf32> to vector<8x32xf32>
    %98 = arith.subf %92, %97 : vector<8x32xf32>
    %99 = arith.mulf %98, %98 : vector<8x32xf32>
    %cst_45 = arith.constant dense<0.000000e+00> : vector<8xf32>
    %100 = vector.multi_reduction <add>, %99, %cst_45 [1] : vector<8x32xf32> to vector<8xf32>
    %101 = vector.shape_cast %100 : vector<8xf32> to vector<8x1xf32>
    %cst_46 = arith.constant 3.200000e+01 : f32
    %102 = vector.broadcast %cst_46 : f32 to vector<8x1xf32>
    %103 = arith.divf %101, %102 : vector<8x1xf32>
    %104 = vector.broadcast %96 : vector<8x1xf32> to vector<8x32xf32>
    %105 = arith.subf %92, %104 : vector<8x32xf32>
    %cst_47 = arith.constant 9.99999974E-6 : f32
    %106 = vector.broadcast %cst_47 : f32 to vector<8x1xf32>
    %107 = arith.addf %103, %106 : vector<8x1xf32>
    %108 = math.rsqrt %107 : vector<8x1xf32>
    %109 = vector.broadcast %108 : vector<8x1xf32> to vector<8x32xf32>
    %110 = arith.mulf %105, %109 : vector<8x32xf32>
    %c0_48 = arith.constant 0 : index
    %c0_49 = arith.constant 0 : index
    %111 = vector.load %arg12[%c0_48, %c0_49] : memref<1x32xf32, #tpu.memory_space<vmem>>, vector<1x32xf32>
    %112 = vector.broadcast %111 : vector<1x32xf32> to vector<8x32xf32>
    %113 = arith.mulf %110, %112 : vector<8x32xf32>
    %c0_50 = arith.constant 0 : index
    %c0_51 = arith.constant 0 : index
    %114 = vector.load %arg13[%c0_50, %c0_51] : memref<1x32xf32, #tpu.memory_space<vmem>>, vector<1x32xf32>
    %115 = vector.broadcast %114 : vector<1x32xf32> to vector<8x32xf32>
    %116 = arith.addf %113, %115 : vector<8x32xf32>
    %117 = vector.shape_cast %116 : vector<8x32xf32> to vector<1x8x32xf32>
    %c0_52 = arith.constant 0 : index
    %c0_53 = arith.constant 0 : index
    %c0_54 = arith.constant 0 : index
    %118 = vector.load %arg14[%c0_52, %c0_53, %c0_54] : memref<1x8x32xf32, #tpu.memory_space<vmem>>, vector<1x8x32xf32>
    tpu.vector_store %arg14[%c0_52, %c0_53, %c0_54], %117 {strides = array<i32>} : memref<1x8x32xf32, #tpu.memory_space<vmem>>, vector<1x8x32xf32>,
    return
  }
  func.func @transform_0(%arg0: i32) -> (i32, i32, i32) {
    %c0_i32 = arith.constant 0 : i32
    %c0_i32_0 = arith.constant 0 : i32
    %c0_i32_1 = arith.constant 0 : i32
    return %arg0, %c0_i32, %c0_i32_0 : i32, i32, i32
  }
  func.func @transform_1(%arg0: i32) -> (i32, i32) {
    %c0_i32 = arith.constant 0 : i32
    %c0_i32_0 = arith.constant 0 : i32
    %c0_i32_1 = arith.constant 0 : i32
    return %c0_i32, %c0_i32_0 : i32, i32
  }
  func.func @transform_2(%arg0: i32) -> (i32, i32) {
    %c0_i32 = arith.constant 0 : i32
    %c0_i32_0 = arith.constant 0 : i32
    %c0_i32_1 = arith.constant 0 : i32
    return %c0_i32, %c0_i32_0 : i32, i32
  }
  func.func @transform_3(%arg0: i32) -> (i32, i32, i32) {
    %c0_i32 = arith.constant 0 : i32
    %c0_i32_0 = arith.constant 0 : i32
    %c0_i32_1 = arith.constant 0 : i32
    %c0_i32_2 = arith.constant 0 : i32
    return %c0_i32, %c0_i32_0, %c0_i32_1 : i32, i32, i32
  }
  func.func @transform_4(%arg0: i32) -> (i32, i32) {
    %c0_i32 = arith.constant 0 : i32
    %c0_i32_0 = arith.constant 0 : i32
    %c0_i32_1 = arith.constant 0 : i32
    return %c0_i32, %c0_i32_0 : i32, i32
  }
  func.func @transform_5(%arg0: i32) -> (i32, i32) {
    %c0_i32 = arith.constant 0 : i32
    %c0_i32_0 = arith.constant 0 : i32
    %c0_i32_1 = arith.constant 0 : i32
    return %c0_i32, %c0_i32_0 : i32, i32
  }
  func.func @transform_6(%arg0: i32) -> (i32, i32) {
    %c0_i32 = arith.constant 0 : i32
    %c0_i32_0 = arith.constant 0 : i32
    %c0_i32_1 = arith.constant 0 : i32
    return %c0_i32, %c0_i32_0 : i32, i32
  }
  func.func @transform_7(%arg0: i32) -> (i32, i32) {
    %c0_i32 = arith.constant 0 : i32
    %c0_i32_0 = arith.constant 0 : i32
    %c0_i32_1 = arith.constant 0 : i32
    return %c0_i32, %c0_i32_0 : i32, i32
  }
  func.func @transform_8(%arg0: i32) -> (i32, i32) {
    %c0_i32 = arith.constant 0 : i32
    %c0_i32_0 = arith.constant 0 : i32
    %c0_i32_1 = arith.constant 0 : i32
    return %c0_i32, %c0_i32_0 : i32, i32
  }
  func.func @transform_9(%arg0: i32) -> (i32, i32) {
    %c0_i32 = arith.constant 0 : i32
    %c0_i32_0 = arith.constant 0 : i32
    %c0_i32_1 = arith.constant 0 : i32
    return %c0_i32, %c0_i32_0 : i32, i32
  }
  func.func @transform_10(%arg0: i32) -> (i32, i32) {
    %c0_i32 = arith.constant 0 : i32
    %c0_i32_0 = arith.constant 0 : i32
    %c0_i32_1 = arith.constant 0 : i32
    return %c0_i32, %c0_i32_0 : i32, i32
  }
  func.func @transform_11(%arg0: i32) -> (i32, i32) {
    %c0_i32 = arith.constant 0 : i32
    %c0_i32_0 = arith.constant 0 : i32
    %c0_i32_1 = arith.constant 0 : i32
    return %c0_i32, %c0_i32_0 : i32, i32
  }
  func.func @transform_12(%arg0: i32) -> (i32, i32) {
    %c0_i32 = arith.constant 0 : i32
    %c0_i32_0 = arith.constant 0 : i32
    %c0_i32_1 = arith.constant 0 : i32
    return %c0_i32, %c0_i32_0 : i32, i32
  }
  func.func @transform_13(%arg0: i32) -> (i32, i32, i32) {
    %c0_i32 = arith.constant 0 : i32
    %c0_i32_0 = arith.constant 0 : i32
    %c0_i32_1 = arith.constant 0 : i32
    return %arg0, %c0_i32, %c0_i32_0 : i32, i32, i32
  }
}

</mosaic_0001>

<bundles_post_ra>
// kernel: tpu_custom_call.1
= control target key start
LH: loop header
LB: loop body
LE: loop exit
PB: predicated region body
PF: predicated region fallthrough
CT: control target
= control target key end

     0   :  { %s2353_s0 = inlined_call_operand.hbm [shape: f32[2,8,32], index: 0, kind: input, shape index: {}]   ;;  %s2354_s1 = inlined_call_operand.vmem [shape: f32[32,96], index: 1, kind: input, shape index: {}]   ;;  %s2355_s2 = inlined_call_operand.vmem [shape: f32[1,96], index: 2, kind: input, shape index: {}]   ;;  %s2356_s3 = inlined_call_operand.vmem [shape: f32[2,16,32], index: 3, kind: input, shape index: {}]   ;;  %s2357_s4 = inlined_call_operand.vmem [shape: f32[1,32], index: 4, kind: input, shape index: {}]   ;;  %s2358_s5 = inlined_call_operand.hbm [shape: f32[1,32], index: 5, kind: input, shape index: {}]   ;;  %s2359_s6 = inlined_call_operand.hbm [shape: f32[1,32], index: 6, kind: input, shape index: {}]   ;;  %s2360_s7 = inlined_call_operand.vmem [shape: f32[32,64], index: 7, kind: input, shape index: {}]   ;;  %s2361_s8 = inlined_call_operand.hbm [shape: f32[1,64], index: 8, kind: input, shape index: {}]   ;;  %s2362_s9 = inlined_call_operand.vmem [shape: f32[64,32], index: 9, kind: input, shape index: {}]   ;;  %s2363_s10 = inlined_call_operand.vmem [shape: f32[1,32], index: 10, kind: input, shape index: {}]   ;;  %s2364_s11 = inlined_call_operand.vmem [shape: f32[1,32], index: 11, kind: input, shape index: {}]   ;;  %s2365_s12 = inlined_call_operand.vmem [shape: f32[1,32], index: 12, kind: input, shape index: {}]   ;;  %s2366_s13 = inlined_call_operand.hbm [shape: f32[2,8,32], index: 13, kind: output, shape index: {}]  }
   0x1   :  { %2373 = sst [smem:[#allocation17_spill]] %s2353_s0 }
   0x2   :  { %2374 = sst [smem:[#allocation18_spill]] %s2354_s1 }
   0x3   :  { %2375 = sst [smem:[#allocation19_spill]] %s2364_s11 }
   0x4   :  { %2376 = sst [smem:[#allocation20_spill]] %s2365_s12 }
   0x5   :  { %2377 = sst [smem:[#allocation21_spill]] %s2366_s13 }
   0x6   :  { %18 = vsyncpa [#allocation3], 0 }
   0x7   :  { %20 = vsyncpa [#allocation3 + $0x1], 0 }
   0x8   :  { %21 = vsyncpa [#allocation6], 0 }
   0x9   :  { %22 = vsyncpa [#allocation9], 0 }
   0xa   :  { %23 = vsyncpa [#allocation4], 0 }
   0xb   :  { %25 = vsyncpa [#allocation4 + $0x1], 0  ;;  %s1966_s25 = smov 0   ;;  %s1968_s26 = smov 0  }
   0xc   :  { %s1970_s27 = smov 0   ;;  %s1972_s28 = smov 0  }
   0xd LB: > { %2378 = sst [smem:[#allocation15_spill]] %s1869_s25  ;;  %s1987_s29 = sadd.s32 4294967295, %s1881_s28   ;;  %s1881_s28 = sphi %s1972_s28, %s2406_s28   ;;  %s1877_s27 = sphi %s1970_s27, %s2405_s27   ;;  %s1873_s26 = sphi %s1968_s26, %s2404_s26   ;;  %s1869_s25 = sphi %s1966_s25, %s2403_s25  }
   0xe   : > { %s1419_s30 = sadd.s32 4294967294, %s1881_s28   ;;  %p51_p0 = scmp.ne.s32.totalorder %s1873_s26, %s1869_s25 }
   0xf   : > { %p2370_p1 = scmp.eq.s32.totalorder %s1987_s29, 0  ;;  %p333_p3 = scmp.eq.s32.totalorder %s1419_s30, 1 }
  0x10   : > { %p1420_p5 = scmp.ge.s32.totalorder %s1881_s28, 1  ;;  %p340_p7 = scmp.lt.s32.totalorder %s1881_s28, 3 }
  0x11   : > { %p1996_p4 = por %p2370_p1, %p51_p0  ;;  %p2001_p6 = por %p333_p3, %p51_p0 }
  0x12   : > { %p2006_p8 = pnand %p1420_p5, %p340_p7  ;;  %s1883_s17 = smov [#allocation5]  }
  0x13   : > { %s2379_s14 = scalar_select %p1996_p4, 1, 0 }
  0x14   : > { %s2380_s15 = scalar_select %p2001_p6, 1, 0 }
  0x15   : > { %s2382_s16 = scalar_select %p2006_p8, 1, 0 }
  0x16   : > { %2381 = sst [smem:[#allocation16_spill]] %s2380_s15  ;;  %s365_s18 = sshll.u32 %s1883_s17, 4  ;;  %s366_s18 = int_to_ptr.vmem [resolvable:$true] %s365_s18 }
  0x17   : > { %p1612_p10 = pneg %p2006_p8  ;;  %s1884_s19 = smov [#allocation7]  }
  0x18   : > { %s376_s20 = sshll.u32 %s1884_s19, 4  ;;  %s1885_s22 = smov [#allocation8]   ;;  %s2019_s20 = int_to_ptr.vmem [resolvable:$true] %s376_s20 }
  0x19   : > { %p2015_p11 = pnand %p1612_p10, %p2370_p1  ;;  %s390_s23 = sshll.u32 %s1885_s22, 4  ;;  %s2021_s23 = int_to_ptr.vmem [resolvable:$true] %s390_s23 }
  0x1a   : > { %s1693_s17 = scalar_lea.hbm %s2358_s5, 16 }
  0x1b   : > { %p1694_p12 = scmp.ne.s32.totalorder %s2358_s5, %s1693_s17  ;;  %p2031_p13 = pneg %p2015_p11 }
  0x1c   : > { %p1700_p5 = scmp.lt.u32.totalorder %s1693_s17, %s2358_s5 }
  0x1d   : > { %p1696_p0 = pnand %p2031_p13, %p1694_p12 }
  0x1f   : > { %p1697_p3 = pneg %p1696_p0 }
  0x21   : > { %p1702_p7 = pnand %p1700_p5, %p1697_p3 }
  0x23   : > { %1705 = shalt.err (!%p1702_p7)
}
  0x24   : > { %s1706_s24 = scalar_lea.vmem %s366_s18, 16  ;;  %s1713_s25 = scalar_lea.vmem %s366_s18, 32 }
  0x25   : > { %p1707_p10 = scmp.ne.s32.totalorder %s366_s18, %s1706_s24  ;;  %p1714_p2 = scmp.lt.s32.totalorder %s366_s18, %s366_s18 }
  0x26   : > { %p1715_p6 = scmp.lt.s32.totalorder %s1713_s25, %s1706_s24 }
  0x27   : > { %p1709_p9 = pnand %p1707_p10, %p2031_p13 }
  0x28   : > { %p1716_p4 = por %p1715_p6, %p1714_p2 }
  0x29   : > { %p1710_p1 = pneg %p1709_p9 }
  0x2b   : > { %p1717_p8 = pnand %p1716_p4, %p1710_p1 }
  0x2d   : > { %1720 = shalt.err (!%p1717_p8)
}
  0x2e   : > { %1615 = dma.hbm_to_vmem [thread:$0]  (!%p2015_p11), %s2358_s5, 16, %s366_s18, [#allocation6]  }
  0x2f   : > { %s1721_s22 = scalar_lea.hbm %s2359_s6, 16 }
  0x30   : > { %p1722_p9 = scmp.ne.s32.totalorder %s2359_s6, %s1721_s22  ;;  %p1728_p1 = scmp.lt.u32.totalorder %s1721_s22, %s2359_s6 }
  0x32   : > { %p1724_p12 = pnand %p1722_p9, %p2031_p13 }
  0x34   : > { %p1725_p2 = pneg %p1724_p12 }
  0x36   : > { %p1730_p4 = pnand %p1728_p1, %p1725_p2 }
  0x38   : > { %1733 = shalt.err (!%p1730_p4)
}
  0x39   : > { %s1734_s18 = scalar_lea.vmem %s2019_s20, 16  ;;  %s1741_s11 = scalar_lea.vmem %s2019_s20, 32 }
  0x3a   : > { %p1735_p6 = scmp.ne.s32.totalorder %s2019_s20, %s1734_s18  ;;  %p1742_p3 = scmp.lt.s32.totalorder %s2019_s20, %s2019_s20 }
  0x3b   : > { %p1743_p5 = scmp.lt.s32.totalorder %s1741_s11, %s1734_s18 }
  0x3c   : > { %p1737_p8 = pnand %p1735_p6, %p2031_p13 }
  0x3d   : > { %p1744_p7 = por %p1743_p5, %p1742_p3 }
  0x3e   : > { %p1738_p0 = pneg %p1737_p8 }
  0x40   : > { %p1745_p10 = pnand %p1744_p7, %p1738_p0 }
  0x42   : > { %1748 = shalt.err (!%p1745_p10)
}
  0x43   : > { %1618 = dma.hbm_to_vmem [thread:$0]  (!%p2015_p11), %s2359_s6, 16, %s2019_s20, [#allocation6]  }
  0x44   : > { %s1749_s17 = scalar_lea.hbm %s2361_s8, 16 }
  0x45   : > { %p1750_p9 = scmp.ne.s32.totalorder %s2361_s8, %s1749_s17  ;;  %p1756_p1 = scmp.lt.u32.totalorder %s1749_s17, %s2361_s8 }
  0x47   : > { %p1752_p12 = pnand %p1750_p9, %p2031_p13 }
  0x49   : > { %p1753_p2 = pneg %p1752_p12 }
  0x4b   : > { %p1758_p4 = pnand %p1756_p1, %p1753_p2 }
  0x4d   : > { %1761 = shalt.err (!%p1758_p4)
}
  0x4e   : > { %s1762_s20 = scalar_lea.vmem %s2021_s23, 16  ;;  %s1769_s11 = scalar_lea.vmem %s2021_s23, 32 }
  0x4f   : > { %p1763_p6 = scmp.ne.s32.totalorder %s2021_s23, %s1762_s20  ;;  %p1770_p3 = scmp.lt.s32.totalorder %s2021_s23, %s2021_s23 }
  0x50   : > { %p1771_p5 = scmp.lt.s32.totalorder %s1769_s11, %s1762_s20 }
  0x51   : > { %p1765_p8 = pnand %p1763_p6, %p2031_p13 }
  0x52   : > { %p1772_p7 = por %p1771_p5, %p1770_p3 }
  0x53   : > { %p1766_p0 = pneg %p1765_p8 }
  0x55   : > { %p1773_p10 = pnand %p1772_p7, %p1766_p0 }
  0x57   : > { %1776 = shalt.err (!%p1773_p10)
}
  0x58   : > { %1621 = dma.hbm_to_vmem [thread:$0]  (!%p2015_p11), %s2361_s8, 16, %s2021_s23, [#allocation9]  }
  0x59   : > { %s2096_s19 = sadd.s32 1, %s1881_s28   ;;  %s38_s30 = sadd.s32 1, %s1877_s27 }
  0x5a   : > { %s35_s21 = ssub.s32 %s1881_s28, %s2096_s19  ;;  %p45_p9 = scmp.ne.s32.totalorder %s1877_s27, %s1873_s26 }
  0x5b   : > { %p36_p13 = scmp.eq.s32.totalorder %s35_s21, 0  ;;  %p46_p12 = scmp.eq.s32.totalorder %s1881_s28, 0 }
  0x5c   : > { %p1633_p2 = scmp.lt.s32.totalorder %s1881_s28, 2  ;;  %p2385_p4 = scmp.eq.s32.totalorder %s1987_s29, 1 }
  0x5d   : > { %s2106_s13 = scalar_select %p36_p13, %s1877_s27, %s38_s30  }
  0x5e   : > { %p47_p1 = por %p46_p12, %p45_p9  ;;  %p2110_p6 = por %p2385_p4, %p45_p9 }
  0x5f   : > { %s413_s22 = sand.u32 1, %s1877_s27   ;;  %s1426_s24 = sshll.u32 %s1881_s28, 7 }
  0x60   : > { %s1425_s23 = sshll.u32 %s413_s22, 3  ;;  %s2387_s0 = sld [smem:[#allocation17_spill]] }
  0x61   : > { %s417_s11 = scalar_lea.vmem [#allocation2], %s1425_s23  ;;  %p2121_p11 = pnand %p1633_p2, %p47_p1 }
  0x62   : > { %s424_s12 = sshll.u32 %s417_s11, 4  ;;  %s414_s21 = scalar_lea.sflag [#allocation3], %s413_s22  ;;  %s2125_s12 = int_to_ptr.vmem [resolvable:$true] %s424_s12 }
  0x63   : > { %p1779_p0 = pneg %p2121_p11 }
  0x66   : > { %s2119_s20 = scalar_lea.hbm %s2387_s0, %s1426_s24  ;;  %s1782_s25 = scalar_lea.hbm %s2387_s0, 256 }
  0x67   : > { %s1777_s30 = scalar_lea.hbm %s2119_s20, 128  ;;  %p1783_p7 = scmp.lt.u32.totalorder %s2119_s20, %s2387_s0 }
  0x68   : > { %p1778_p8 = scmp.ne.s32.totalorder %s2119_s20, %s1777_s30  ;;  %p1784_p10 = scmp.lt.u32.totalorder %s1782_s25, %s1777_s30 }
  0x69   : > { %p1786_p9 = scmp.lt.u32.totalorder %s1777_s30, %s2119_s20 }
  0x6a   : > { %p1780_p3 = pnand %p1779_p0, %p1778_p8  ;;  %p1785_p13 = por %p1784_p10, %p1783_p7 }
  0x6c   : > { %p1781_p5 = pneg %p1780_p3  ;;  %p1787_p12 = por %p1786_p9, %p1785_p13 }
  0x6e   : > { %p1788_p2 = pnand %p1787_p12, %p1781_p5 }
  0x70   : > { %1791 = shalt.err (!%p1788_p2)
}
  0x71   : > { %s1792_s22 = scalar_lea.vmem %s2125_s12, 128  ;;  %s1886_s24 = smov [#allocation2]  }
  0x72   : > { %p1793_p1 = scmp.ne.s32.totalorder %s2125_s12, %s1792_s22  ;;  %s1797_s23 = sshll.u32 %s1886_s24, 4  ;;  %s1798_s23 = int_to_ptr.vmem [resolvable:$false] %s1797_s23 }
  0x73   : > { %s1799_s18 = scalar_lea.vmem %s1798_s23, 256  ;;  %p1800_p3 = scmp.lt.s32.totalorder %s2125_s12, %s1798_s23 }
  0x74   : > { %p1795_p4 = pnand %p1793_p1, %p1779_p0  ;;  %p1801_p7 = scmp.lt.s32.totalorder %s1799_s18, %s1792_s22 }
  0x76   : > { %p1796_p8 = pneg %p1795_p4  ;;  %p1802_p10 = por %p1801_p7, %p1800_p3 }
  0x78   : > { %p1803_p13 = pnand %p1802_p10, %p1796_p8 }
  0x7a   : > { %1806 = shalt.err (!%p1803_p13)
}
  0x7b   : > { %1625 = dma.hbm_to_vmem [thread:$0]  (!%p2121_p11), %s2119_s20, 128, %s2125_s12, %s414_s21  }
  0x7c   : > { %p2389_p5 = scmp.ne.s32.totalorder %s2382_s16, 0 }
  0x7d   : > { %s2155_s30 = sand.u32 (!%p2389_p5), 1, %s1873_s26   ;;  %p2390_p0 = scmp.ne.s32.totalorder (!%p2389_p5), %s2379_s14, 0 }
  0x7e   : > { %433 = sbr.rel (%p2389_p5) target bundleno = 2521 (0x9d9), region = 72  ;;  %s1428_s25 = sshll.u32 (!%p2389_p5), %s2155_s30, 3 }
  0x7f   : > { %s436_s11 = scalar_lea.sflag (!%p2389_p5), [#allocation3], %s2155_s30  ;;  %s439_s22 = scalar_lea.vmem (!%p2389_p5), [#allocation2], %s1428_s25 }
  0x85   : > { %1852 = dma.done.wait (%p2390_p0), %s436_s11, 128  }
  0x86   : > { %1854 = vsyncadd (%p2390_p0), %s436_s11, 4294967168  ;;  %p2391_p11 = scmp.eq.s32.totalorder %s1987_s29, 0 }
  0x88   : > { %1856 = dma.done.wait (%p2391_p11), [#allocation6], 32   ;;  %p2392_p9 = pmov %p2391_p11 }
  0x8a   : > { %1858 = vsyncadd (%p2392_p9), [#allocation6], 4294967264  ;;  %p2393_p12 = pmov %p2392_p9 }
  0x8b   : > { %p2394_p2 = pmov %p2392_p9 }
  0x8c   : > { %1860 = dma.done.wait (%p2393_p12), [#allocation9], 16  }
  0x8d   : > { %1862 = vsyncadd (%p2394_p2), [#allocation9], 4294967280  ;;  %v1887_v0 = vmov 0.0|0.0   ;;  %vm1888_vm0 = vmmov 0   ;;  %v1889_v1 = vmov 0.0   ;;  %s2395_s1 = sld [smem:[#allocation18_spill]] }
  0x8e   : > { %1566 = vmatprep.subr.bf16.mxu0 %v1887_v0  ;;  %1499 = vmatprep.mubr.msk.f32.mxu0 %vm1888_vm0, %v1889_v1  ;;  %v2192_v8 = vld [vmem:[%s439_s22] sm:$0xff]  ;;  %vm506_vm1 = vcmask 261120   ;;  %s1890_s14 = smov 112   ;;  %s1891_s22 = smov 96   ;;  %vm583_vm2 = vcmask 130048   ;;  %vm658_vm3 = vcmask 64512  }
  0x8f   : > { %1507 = vmatprep.subr.mxu1 %v1889_v1  ;;  %1509 = vmatprep.mubr.msk.f32.mxu1 %vm1888_vm0, %v1889_v1  ;;  %v1433_v9 = vld [vmem:[%s2355_s2] ss:$0 sm:$0xff]  ;;  %s1892_s16 = smov 80   ;;  %s1893_s20 = smov 48   ;;  %v747_v38 = vld [vmem:[%s2356_s3 + $0x8] sm:$0xff]  ;;  %v1441_v43 = vld [vmem:[%s2356_s3 + $0x10] sm:$0xff] }
  0x90   : > { %s1894_s12 = smov 64   ;;  %v746_v37 = vld [vmem:[%s2356_s3] sm:$0xff]  ;;  %v1442_v44 = vld [vmem:[%s2356_s3 + $0x18] sm:$0xff]  ;;  %vm1201_vm4 = vcmask 523264   ;;  %s2396_s11 = sld [smem:[#allocation19_spill]] }
  0x91   : > { %v1576_v41 = vpack.c.bf16 %v747_v38, %v746_v37  ;;  %v1573_v45 = vpack.c.bf16 %v1442_v44, %v1441_v43  ;;  %v1445_v53 = vld [vmem:[%s2357_s4] ss:$0 sm:$0xff]  ;;  %s2398_s0 = sld [smem:[#allocation21_spill]]  ;;  %s1307_s23 = scalar_lea.sflag [#allocation4], %s2155_s30 }
  0x93   : > { %v495_v2 = vld [vmem:[%s2395_s1] sm:$0xff]  ;;  %v496_v3 = vld [vmem:[%s2395_s1 + $0x8] sm:$0xff]  ;;  %v497_v4 = vld [vmem:[%s2395_s1 + $0x10] sm:$0xff] }
  0x94   : > { %v1567_v5 = vpack.c.bf16 %v496_v3, %v495_v2  ;;  %v498_v6 = vld [vmem:[%s2395_s1 + $0x18] sm:$0xff]  ;;  %v1102_v2 = vld [vmem:[%s2360_s7 + $0x8] sm:$0xff] }
  0x95   : > { %v1570_v7 = vpack.c.bf16 %v498_v6, %v497_v4  ;;  %v1103_v4 = vld [vmem:[%s2360_s7 + $0x10] sm:$0xff] }
  0x96   : > { %1568 = vmatpush3.bf16.msra.mxu0 %v1567_v5  ;;  %v1104_v5 = vld [vmem:[%s2360_s7 + $0x18] sm:$0xff] }
  0x97   : > { %1569 = vmatprep.subr.bf16.mxu0 %v1887_v0  ;;  %v1582_v6 = vpack.c.bf16 %v1104_v5, %v1103_v4 }
  0x9a   : > { %1571 = vmatpush3.bf16.msra.mxu0 %v1570_v7  ;;  %v1186_v7 = vld [vmem:[%s2362_s9] sm:$0xff] }
  0x9b   : > { %1502 = vmatprep.subr.mxu0 %v1889_v1 }
  0x9d   : > { %1500 = vmatmul.mubr.msk.f32.vlgmr.msra.gmra.mrb[0].mxu0 %vm506_vm1, %v2192_v8 }
  0x9e   : > { %1504 = vmatprep.mubr.msk.f32.mxu0 %vm1888_vm0, %v1889_v1 }
 0x170   : > { %v576_v10 = vpop.f32.mrb[0].mxu0 }
 0x171   : > { %v577_v11 = vadd.f32 %v1433_v9, %v576_v10  ;;  %v1501_v12 = vpop.f32.mrb[1].mxu0  ;;  %v1188_v9 = vld [vmem:[%s2362_s9 + $0x10] sm:$0xff] }
 0x173   : > { %748 = vrot.lane.b32.xlu1 %v577_v11, %s1890_s14  ;;  %581 = vrot.lane.b32.xlu0 %v577_v11, %s1891_s22 }
 0x177   : > { %750 = vrot.lane.b32.xlu0 %v577_v11, %s1892_s16  ;;  %s2397_s16 = sld [smem:[#allocation20_spill]] }
 0x1e5   : > { %v582_v13 = vpop.permute.xlu0 %581  ;;  %v749_v15 = vpop.permute.xlu1 %748 }
 0x1e6   : > { %1503 = vmatpush3.xpose.msk.msra.mxu0 %vm583_vm2, %v582_v13  ;;  %v1190_v13 = vld [vmem:[%s2362_s9 + $0x20] sm:$0xff] }
 0x1e7   : > { %1512 = vmatprep.subr.mxu0 %v1889_v1 }
 0x1e9   : > { %1505 = vmatmul.mubr.msk.f32.vlgmr.msra.gmra.mrb[2].mxu0 %vm583_vm2, %v577_v11  ;;  %v751_v14 = vpop.permute.xlu0 %750 }
 0x1ea   : > { %1513 = vmatpush3.xpose.msk.msra.mxu0 %vm583_vm2, %v751_v14  ;;  %1514 = vmatprep.mubr.msk.f32.mxu0 %vm1888_vm0, %v1889_v1  ;;  %v1191_v14 = vld [vmem:[%s2362_s9 + $0x28] sm:$0xff] }
 0x1eb   : > { %1572 = vmatprep.subr.bf16.mxu0 %v1887_v0 }
 0x1ed   : > { %1515 = vmatmul.mubr.msk.f32.vlgmr.msra.gmra.mrb[4].mxu0 %vm583_vm2, %v749_v15  ;;  %v1591_v15 = vpack.c.bf16 %v1191_v14, %v1190_v13 }
 0x1ee   : > { %1526 = vmatprep.mubr.msk.f32.mxu0 %vm1888_vm0, %v1889_v1  ;;  %1574 = vmatpush3.bf16.msra.mxu0 %v1573_v45 }
 0x1ef   : > { %1578 = vmatprep.subr.bf16.mxu0 %v1887_v0 }
 0x2bc   : > { %v654_v16 = vpop.f32.mrb[2].mxu0 }
 0x2bd   : > { %v1506_v17 = vpop.f32.mrb[3].mxu0  ;;  %v659_v18 = vsel %vm658_vm3, %v654_v16, -inf }
 0x2be   : > { %660 = vmax.xlane.f32.xlu1 %v659_v18 }
 0x2c0   : > { %v822_v19 = vpop.f32.mrb[4].mxu0 }
 0x2c1   : > { %v1516_v20 = vpop.f32.mrb[5].mxu0  ;;  %v826_v21 = vsel %vm658_vm3, %v822_v19, -inf }
 0x2c2   : > { %827 = vmax.xlane.f32.xlu0 %v826_v21  ;;  %v1446_v20 = vld [vmem:[#allocation5] ss:$0 sm:$0xff] }
 0x34b   : > { %v661_v22 = vpop.xlane.xlu1 %660 }
 0x34c   : > { %v662_v23 = vsub.f32 %v654_v16, %v661_v22  ;;  %v1447_v22 = vld [vmem:[#allocation7] ss:$0 sm:$0xff] }
 0x34e   : > { %v663_v24 = vmul.f32 1.442695, %v662_v23 }
 0x34f   : > { %v828_v25 = vpop.xlane.xlu0 %827 }
 0x350   : > { %1681 = vpow2.f32 %v663_v24  ;;  %v829_v26 = vsub.f32 %v822_v19, %v828_v25  ;;  %v1192_v25 = vld [vmem:[%s2362_s9 + $0x30] sm:$0xff] }
 0x352   : > { %v830_v27 = vmul.f32 1.442695, %v829_v26 }
 0x354   : > { %1683 = vpow2.f32 %v830_v27  ;;  %v1448_v27 = vld [vmem:[#allocation8] ss:$0 sm:$0xff] }
 0x35a   : > { %v1682_v28 = vpop.eup %1681 }
 0x35b   : > { %v665_v29 = vsel %vm658_vm3, %v1682_v28, 0.0 }
 0x35c   : > { %666 = vadd.xlane.f32.xlu0 %v665_v29 }
 0x35e   : > { %v1684_v30 = vpop.eup %1683 }
 0x35f   : > { %v832_v31 = vsel %vm658_vm3, %v1684_v30, 0.0 }
 0x360   : > { %833 = vadd.xlane.f32.xlu1 %v832_v31 }
 0x371   : > { %837 = vrot.lane.b32.xlu1 %v577_v11, %s1893_s20  ;;  %s1455_s20 = sshll.u32 %s1987_s29, 7  ;;  %s1895_s29 = smov [#allocation10]  }
 0x372   : > { %670 = vrot.lane.b32.xlu0 %v577_v11, %s1894_s12  ;;  %v1189_v11 = vld [vmem:[%s2362_s9 + $0x18] sm:$0xff]  ;;  %s493_s12 = scalar_lea.vmem [#allocation10], %s1428_s25  ;;  %s2308_s1 = scalar_lea.hbm %s2398_s0, %s1455_s20 }
 0x373   : > { %v1588_v12 = vpack.c.bf16 %v1189_v11, %v1188_v9  ;;  %s1320_s15 = sshll.u32 %s493_s12, 4  ;;  %s1811_s25 = sshll.u32 %s1895_s29, 4  ;;  %s2310_s15 = int_to_ptr.vmem [resolvable:$true] %s1320_s15  ;;  %s1812_s25 = int_to_ptr.vmem [resolvable:$false] %s1811_s25 }
 0x374   : > { %s1807_s18 = scalar_lea.vmem %s2310_s15, 128  ;;  %p1814_p3 = scmp.lt.s32.totalorder %s2310_s15, %s1812_s25 }
 0x375   : > { %p1808_p1 = scmp.ne.s32.totalorder %s2310_s15, %s1807_s18 }
 0x377   : > { %p1809_p4 = pnand %p1808_p1, %p2110_p6 }
 0x379   : > { %p1810_p8 = pneg %p1809_p4 }
 0x3e9   : > { %v667_v32 = vpop.xlane.xlu0 %666 }
 0x3ea   : > { %1685 = vrcp.f32 %v667_v32  ;;  %v1450_v32 = vld [vmem:[%s2363_s10] ss:$0 sm:$0xff] }
 0x3ed   : > { %v834_v33 = vpop.xlane.xlu1 %833  ;;  %v671_v34 = vpop.permute.xlu0 %670 }
 0x3ee   : > { %1687 = vrcp.f32 %v834_v33  ;;  %1508 = vmatpush3.msra.mxu1 %v671_v34 }
 0x3ef   : > { %1517 = vmatprep.subr.mxu1 %v1889_v1 }
 0x3f1   : > { %v838_v39 = vpop.permute.xlu1 %837 }
 0x3f4   : > { %v1686_v35 = vpop.eup %1685 }
 0x3f5   : > { %v669_v36 = vmul.f32 %v1686_v35, %v1682_v28 }
 0x3f7   : > { %1510 = vmatmul.mubr.msk.f32.vlgmr.msra.gmra.mrb[0].mxu1 %vm658_vm3, %v669_v36 }
 0x3f8   : > { %v1688_v40 = vpop.eup %1687  ;;  %1518 = vmatpush3.msra.mxu1 %v838_v39  ;;  %1519 = vmatprep.mubr.msk.f32.mxu1 %vm1888_vm0, %v1889_v1 }
 0x3f9   : > { %v836_v42 = vmul.f32 %v1688_v40, %v1684_v30  ;;  %1575 = vmatprep.subr.bf16.mxu1 %v1887_v0 }
 0x3fb   : > { %1520 = vmatmul.mubr.msk.f32.vlgmr.msra.gmra.mrb[2].mxu1 %vm658_vm3, %v836_v42 }
 0x3fc   : > { %1577 = vmatpush3.bf16.msra.mxu1 %v1576_v41  ;;  %1533 = vmatprep.mubr.msk.f32.mxu1 %vm1888_vm0, %v1889_v1 }
 0x3fd   : > { %1584 = vmatprep.subr.bf16.mxu1 %v1887_v0 }
 0x4ca   : > { %v742_v46 = vpop.f32.mrb[0].mxu1 }
 0x4cb   : > { %v1511_v47 = vpop.f32.mrb[1].mxu1  ;;  %1534 = vmatmul.mubr.msk.f32.vlgmr.msra.gmra.mrb[4].mxu1 %vm583_vm2, %v742_v46 }
 0x4cc   : > { %1563 = vmatprep.mubr.msk.f32.mxu1 %vm1888_vm0, %v1889_v1  ;;  %v1452_v47 = vld [vmem:[%s2396_s11] ss:$0 sm:$0xff]  ;;  %s1813_s11 = scalar_lea.vmem %s1812_s25, 256 }
 0x4cd   : > { %p1815_p7 = scmp.lt.s32.totalorder %s1813_s11, %s1807_s18 }
 0x4ce   : > { %v909_v48 = vpop.f32.mrb[2].mxu1 }
 0x4cf   : > { %v1521_v49 = vpop.f32.mrb[3].mxu1  ;;  %1527 = vmatmul.mubr.msk.f32.vlgmr.msra.gmra.mrb[6].mxu0 %vm583_vm2, %v909_v48  ;;  %p1816_p10 = por %p1815_p7, %p1814_p3 }
 0x4d0   : > { %1544 = vmatprep.mubr.msk.f32.mxu0 %vm1888_vm0, %v1889_v1  ;;  %v1101_v1 = vld [vmem:[%s2360_s7] sm:$0xff] }
 0x4d1   : > { %v1579_v3 = vpack.c.bf16 %v1102_v2, %v1101_v1  ;;  %v1453_v49 = vld [vmem:[%s2397_s16] ss:$0 sm:$0xff]  ;;  %p1817_p13 = pnand %p1816_p10, %p1810_p8 }
 0x4d3   : > { %1580 = vmatpush3.bf16.msra.mxu0 %v1579_v3 }
 0x4d4   : > { %1581 = vmatprep.subr.bf16.mxu0 %v1887_v0 }
 0x4d7   : > { %1583 = vmatpush3.bf16.msra.mxu0 %v1582_v6 }
 0x59e   : > { %v1058_v50 = vpop.f32.mrb[4].mxu1 }
 0x59f   : > { %v1535_v51 = vpop.f32.mrb[5].mxu1 }
 0x5a2   : > { %v985_v52 = vpop.f32.mrb[6].mxu0 }
 0x5a3   : > { %v1059_v54 = vadd.f32 %v1058_v50, %v985_v52  ;;  %v1528_v55 = vpop.f32.mrb[7].mxu0 }
 0x5a5   : > { %v1069_v56 = vadd.f32 %v1445_v53, %v1059_v54 }
 0x5a7   : > { %v1070_v57 = vadd.f32 %v1069_v56, %v2192_v8  ;;  %v1187_v8 = vld [vmem:[%s2362_s9 + $0x8] sm:$0xff] }
 0x5a8   : > { %v1585_v10 = vpack.c.bf16 %v1187_v8, %v1186_v7 }
 0x5a9   : > { %v1071_v58 = vsel %vm506_vm1, %v1070_v57, 0.0 }
 0x5aa   : > { %1072 = vadd.xlane.f32.xlu1 %v1071_v58  ;;  %1586 = vmatpush3.bf16.msra.mxu1 %v1585_v10 }
 0x5ab   : > { %1587 = vmatprep.subr.bf16.mxu1 %v1887_v0 }
 0x5ae   : > { %1589 = vmatpush3.bf16.msra.mxu1 %v1588_v12 }
 0x5af   : > { %1590 = vmatprep.subr.bf16.mxu1 %v1887_v0 }
 0x5b2   : > { %1592 = vmatpush3.bf16.msra.mxu1 %v1591_v15 }
 0x5b3   : > { %1593 = vmatprep.subr.bf16.mxu1 %v1887_v0  ;;  %v1193_v0 = vld [vmem:[%s2362_s9 + $0x38] sm:$0xff] }
 0x5b4   : > { %v1594_v26 = vpack.c.bf16 %v1193_v0, %v1192_v25 }
 0x5b6   : > { %1595 = vmatpush3.bf16.msra.mxu1 %v1594_v26 }
 0x637   : > { %v1073_v59 = vpop.xlane.xlu1 %1072 }
 0x638   : > { %v1075_v60 = vmul.f32 0.03125, %v1073_v59 }
 0x63a   : > { %v1076_v61 = vsub.f32 %v1070_v57, %v1075_v60 }
 0x63c   : > { %v1077_v62 = vmul.f32 %v1076_v61, %v1076_v61 }
 0x63e   : > { %v1078_v63 = vsel %vm506_vm1, %v1077_v62, 0.0 }
 0x63f   : > { %1079 = vadd.xlane.f32.xlu0 %v1078_v63 }
 0x6cc   : > { %v1080_v16 = vpop.xlane.xlu0 %1079 }
 0x6cd   : > { %v1081_v17 = vmul.f32 0.03125, %v1080_v16 }
 0x6cf   : > { %v1082_v18 = vadd.f32 1e-05, %v1081_v17 }
 0x6d1   : > { %1689 = vrsqrt.f32 %v1082_v18 }
 0x6db   : > { %v1690_v19 = vpop.eup %1689 }
 0x6dc   : > { %v1084_v21 = vmul.f32 %v1690_v19, %v1076_v61 }
 0x6de   : > { %v1092_v23 = vmul.f32 %v1446_v20, %v1084_v21 }
 0x6e0   : > { %v1100_v24 = vadd.f32 %v1447_v22, %v1092_v23 }
 0x6e2   : > { %1545 = vmatmul.mubr.msk.f32.vlgmr.msra.gmra.mrb[8].mxu0 %vm506_vm1, %v1100_v24 }
 0x7b5   : > { %v1181_v28 = vpop.f32.mrb[8].mxu0 }
 0x7b6   : > { %v1182_v29 = vadd.f32 %v1448_v27, %v1181_v28  ;;  %v1546_v30 = vpop.f32.mrb[9].mxu0 }
 0x7b8   : > { %v1185_v31 = vmax.f32 %v1182_v29, 0.0 }
 0x7ba   : > { %1564 = vmatmul.mubr.msk.f32.vlgmr.msra.gmra.mrb[6].mxu1 %vm1201_vm4, %v1185_v31 }
 0x88d   : > { %v1271_v33 = vpop.f32.mrb[6].mxu1 }
 0x88e   : > { %v1272_v34 = vadd.f32 %v1450_v32, %v1271_v33  ;;  %v1565_v35 = vpop.f32.mrb[7].mxu1 }
 0x890   : > { %v1275_v36 = vadd.f32 %v1272_v34, %v1100_v24 }
 0x892   : > { %v1276_v37 = vsel %vm506_vm1, %v1275_v36, 0.0 }
 0x893   : > { %1277 = vadd.xlane.f32.xlu0 %v1276_v37 }
 0x920   : > { %v1278_v38 = vpop.xlane.xlu0 %1277 }
 0x921   : > { %v1279_v39 = vmul.f32 0.03125, %v1278_v38 }
 0x923   : > { %v1280_v40 = vsub.f32 %v1275_v36, %v1279_v39 }
 0x925   : > { %v1281_v41 = vmul.f32 %v1280_v40, %v1280_v40 }
 0x927   : > { %v1282_v42 = vsel %vm506_vm1, %v1281_v41, 0.0 }
 0x928   : > { %1283 = vadd.xlane.f32.xlu1 %v1282_v42 }
 0x9b5   : > { %v1284_v43 = vpop.xlane.xlu1 %1283 }
 0x9b6   : > { %v1285_v44 = vmul.f32 0.03125, %v1284_v43 }
 0x9b8   : > { %v1286_v45 = vadd.f32 1e-05, %v1285_v44 }
 0x9ba   : > { %1691 = vrsqrt.f32 %v1286_v45 }
 0x9c4   : > { %v1692_v46 = vpop.eup %1691 }
 0x9c5   : > { %v1288_v48 = vmul.f32 %v1692_v46, %v1280_v40 }
 0x9c7   : > { %v1296_v50 = vmul.f32 %v1452_v47, %v1288_v48 }
 0x9c9   : > { %v1304_v51 = vadd.f32 %v1453_v49, %v1296_v50 }
 0x9cb   : > { %1305 = vst.msk [vmem:[%s493_s12] sm:$0xff] %vm506_vm1, %v1304_v51 }
 0x9cc   : > { %1820 = shalt.err (!%p1817_p13)
}
 0x9cd   : > { %s1821_s30 = scalar_lea.hbm %s2308_s1, 128  ;;  %s1825_s16 = scalar_lea.hbm %s2398_s0, 256 }
 0x9ce   : > { %p1822_p5 = scmp.ne.s32.totalorder %s2308_s1, %s1821_s30  ;;  %p1826_p9 = scmp.lt.u32.totalorder %s2308_s1, %s2398_s0 }
 0x9cf   : > { %p1827_p12 = scmp.lt.u32.totalorder %s1825_s16, %s1821_s30  ;;  %p1829_p1 = scmp.lt.u32.totalorder %s1821_s30, %s2308_s1 }
 0x9d0   : > { %p1823_p0 = pnand %p1822_p5, %p2110_p6 }
 0x9d1   : > { %p1828_p2 = por %p1827_p12, %p1826_p9 }
 0x9d2   : > { %p1824_p11 = pneg %p1823_p0 }
 0x9d3   : > { %p1830_p4 = por %p1829_p1, %p1828_p2 }
 0x9d5   : > { %p1831_p8 = pnand %p1830_p4, %p1824_p11 }
 0x9d7   : > { %1834 = shalt.err (!%p1831_p8)
}
 0x9d8   : > { %1610 = dma.vmem_to_hbm [thread:$0]  (%p2110_p6), %s2310_s15, 128, %s2308_s1, %s1307_s23  }
 0x9d9 PF: > { %s2399_s21 = sld [smem:[#allocation15_spill]]  ;;  %s2400_s24 = sld [smem:[#allocation16_spill]] }
 0x9da   : > { %p2402_p7 = scmp.ge.s32.totalorder %s1881_s28, 2 }
 0x9df   : > { %s1332_s18 = sand.u32 1, %s2399_s21   ;;  %p2401_p3 = scmp.ne.s32.totalorder %s2400_s24, 0 }
 0x9e0   : > { %s1333_s29 = scalar_lea.sflag [#allocation4], %s1332_s18 }
 0x9e1   : > { %p1627_p10 = pnand %p2402_p7, %p2401_p3 }
 0x9e3   : > { %1864 = dma.done.wait (!%p1627_p10), %s1333_s29, 128  }
 0x9e4   : > { %1866 = vsyncadd (!%p1627_p10), %s1333_s29, 4294967168  ;;  %p28_p13 = scmp.ge.s32.totalorder %s2096_s19, 4   ;;  %s2403_s25 = smov %s1873_s26 }
 0x9e5   : > { %s2404_s26 = smov %s1877_s27  ;;  %s2405_s27 = smov %s2106_s13 }
 0x9e6   : > { %s2406_s28 = smov %s2096_s19  ;;  %30 = sbr.rel (!%p28_p13) target bundleno = 13 (0xd), region = 130 }
 0x9ed   :  { %1338 = vsyncpa [#allocation3], 1 }
 0x9ee   :  { %1340 = vsyncpa [#allocation3 + $0x1], 1 }
 0x9ef   :  { %1341 = vsyncpa [#allocation6], 1 }
 0x9f0   :  { %1342 = vsyncpa [#allocation9], 1 }
 0x9f1   :  { %1343 = vsyncpa [#allocation4], 1 }
 0x9f2   :  { %1345 = vsyncpa [#allocation4 + $0x1], 1 }

// kernel: tpu_custom_call.1
= control target key start
LH: loop header
LB: loop body
LE: loop exit
PB: predicated region body
PF: predicated region fallthrough
CT: control target
= control target key end

     0   :  { %s2353_s0 = inlined_call_operand.hbm [shape: f32[2,8,32], index: 0, kind: input, shape index: {}]   ;;  %s2354_s1 = inlined_call_operand.vmem [shape: f32[32,96], index: 1, kind: input, shape index: {}]   ;;  %s2355_s2 = inlined_call_operand.vmem [shape: f32[1,96], index: 2, kind: input, shape index: {}]   ;;  %s2356_s3 = inlined_call_operand.vmem [shape: f32[2,16,32], index: 3, kind: input, shape index: {}]   ;;  %s2357_s4 = inlined_call_operand.vmem [shape: f32[1,32], index: 4, kind: input, shape index: {}]   ;;  %s2358_s5 = inlined_call_operand.hbm [shape: f32[1,32], index: 5, kind: input, shape index: {}]   ;;  %s2359_s6 = inlined_call_operand.hbm [shape: f32[1,32], index: 6, kind: input, shape index: {}]   ;;  %s2360_s7 = inlined_call_operand.vmem [shape: f32[32,64], index: 7, kind: input, shape index: {}]   ;;  %s2361_s8 = inlined_call_operand.hbm [shape: f32[1,64], index: 8, kind: input, shape index: {}]   ;;  %s2362_s9 = inlined_call_operand.vmem [shape: f32[64,32], index: 9, kind: input, shape index: {}]   ;;  %s2363_s10 = inlined_call_operand.vmem [shape: f32[1,32], index: 10, kind: input, shape index: {}]   ;;  %s2364_s11 = inlined_call_operand.vmem [shape: f32[1,32], index: 11, kind: input, shape index: {}]   ;;  %s2365_s12 = inlined_call_operand.vmem [shape: f32[1,32], index: 12, kind: input, shape index: {}]   ;;  %s2366_s13 = inlined_call_operand.hbm [shape: f32[2,8,32], index: 13, kind: output, shape index: {}]  }
   0x1   :  { %2373 = sst [smem:[#allocation17_spill]] %s2353_s0 }
   0x2   :  { %2374 = sst [smem:[#allocation18_spill]] %s2354_s1 }
   0x3   :  { %2375 = sst [smem:[#allocation19_spill]] %s2364_s11 }
   0x4   :  { %2376 = sst [smem:[#allocation20_spill]] %s2365_s12 }
   0x5   :  { %2377 = sst [smem:[#allocation21_spill]] %s2366_s13 }
   0x6   :  { %18 = vsyncpa [#allocation3], 0 }
   0x7   :  { %20 = vsyncpa [#allocation3 + $0x1], 0 }
   0x8   :  { %21 = vsyncpa [#allocation6], 0 }
   0x9   :  { %22 = vsyncpa [#allocation9], 0 }
   0xa   :  { %23 = vsyncpa [#allocation4], 0 }
   0xb   :  { %25 = vsyncpa [#allocation4 + $0x1], 0  ;;  %s1966_s25 = smov 0   ;;  %s1968_s26 = smov 0  }
   0xc   :  { %s1970_s27 = smov 0   ;;  %s1972_s28 = smov 0  }
   0xd LB: > { %2378 = sst [smem:[#allocation15_spill]] %s1869_s25  ;;  %s1987_s29 = sadd.s32 4294967295, %s1881_s28   ;;  %s1881_s28 = sphi %s1972_s28, %s2406_s28   ;;  %s1877_s27 = sphi %s1970_s27, %s2405_s27   ;;  %s1873_s26 = sphi %s1968_s26, %s2404_s26   ;;  %s1869_s25 = sphi %s1966_s25, %s2403_s25  }
   0xe   : > { %s1419_s30 = sadd.s32 4294967294, %s1881_s28   ;;  %p51_p0 = scmp.ne.s32.totalorder %s1873_s26, %s1869_s25 }
   0xf   : > { %p2370_p1 = scmp.eq.s32.totalorder %s1987_s29, 0  ;;  %p333_p3 = scmp.eq.s32.totalorder %s1419_s30, 1 }
  0x10   : > { %p1420_p5 = scmp.ge.s32.totalorder %s1881_s28, 1  ;;  %p340_p7 = scmp.lt.s32.totalorder %s1881_s28, 3 }
  0x11   : > { %p1996_p4 = por %p2370_p1, %p51_p0  ;;  %p2001_p6 = por %p333_p3, %p51_p0 }
  0x12   : > { %p2006_p8 = pnand %p1420_p5, %p340_p7  ;;  %s1883_s17 = smov [#allocation5]  }
  0x13   : > { %s2379_s14 = scalar_select %p1996_p4, 1, 0 }
  0x14   : > { %s2380_s15 = scalar_select %p2001_p6, 1, 0 }
  0x15   : > { %s2382_s16 = scalar_select %p2006_p8, 1, 0 }
  0x16   : > { %2381 = sst [smem:[#allocation16_spill]] %s2380_s15  ;;  %s365_s18 = sshll.u32 %s1883_s17, 4  ;;  %s366_s18 = int_to_ptr.vmem [resolvable:$true] %s365_s18 }
  0x17   : > { %p1612_p10 = pneg %p2006_p8  ;;  %s1884_s19 = smov [#allocation7]  }
  0x18   : > { %s376_s20 = sshll.u32 %s1884_s19, 4  ;;  %s1885_s22 = smov [#allocation8]   ;;  %s2019_s20 = int_to_ptr.vmem [resolvable:$true] %s376_s20 }
  0x19   : > { %p2015_p11 = pnand %p1612_p10, %p2370_p1  ;;  %s390_s23 = sshll.u32 %s1885_s22, 4  ;;  %s2021_s23 = int_to_ptr.vmem [resolvable:$true] %s390_s23 }
  0x1a   : > { %s1693_s17 = scalar_lea.hbm %s2358_s5, 16 }
  0x1b   : > { %p1694_p12 = scmp.ne.s32.totalorder %s2358_s5, %s1693_s17  ;;  %p2031_p13 = pneg %p2015_p11 }
  0x1c   : > { %p1700_p5 = scmp.lt.u32.totalorder %s1693_s17, %s2358_s5 }
  0x1d   : > { %p1696_p0 = pnand %p2031_p13, %p1694_p12 }
  0x1f   : > { %p1697_p3 = pneg %p1696_p0 }
  0x21   : > { %p1702_p7 = pnand %p1700_p5, %p1697_p3 }
  0x23   : > { %1705 = shalt.err (!%p1702_p7)
}
  0x24   : > { %s1706_s24 = scalar_lea.vmem %s366_s18, 16  ;;  %s1713_s25 = scalar_lea.vmem %s366_s18, 32 }
  0x25   : > { %p1707_p10 = scmp.ne.s32.totalorder %s366_s18, %s1706_s24  ;;  %p1714_p2 = scmp.lt.s32.totalorder %s366_s18, %s366_s18 }
  0x26   : > { %p1715_p6 = scmp.lt.s32.totalorder %s1713_s25, %s1706_s24 }
  0x27   : > { %p1709_p9 = pnand %p1707_p10, %p2031_p13 }
  0x28   : > { %p1716_p4 = por %p1715_p6, %p1714_p2 }
  0x29   : > { %p1710_p1 = pneg %p1709_p9 }
  0x2b   : > { %p1717_p8 = pnand %p1716_p4, %p1710_p1 }
  0x2d   : > { %1720 = shalt.err (!%p1717_p8)
}
  0x2e   : > { %1615 = dma.hbm_to_vmem [thread:$0]  (!%p2015_p11), %s2358_s5, 16, %s366_s18, [#allocation6]  }
  0x2f   : > { %s1721_s22 = scalar_lea.hbm %s2359_s6, 16 }
  0x30   : > { %p1722_p9 = scmp.ne.s32.totalorder %s2359_s6, %s1721_s22  ;;  %p1728_p1 = scmp.lt.u32.totalorder %s1721_s22, %s2359_s6 }
  0x32   : > { %p1724_p12 = pnand %p1722_p9, %p2031_p13 }
  0x34   : > { %p1725_p2 = pneg %p1724_p12 }
  0x36   : > { %p1730_p4 = pnand %p1728_p1, %p1725_p2 }
  0x38   : > { %1733 = shalt.err (!%p1730_p4)
}
  0x39   : > { %s1734_s18 = scalar_lea.vmem %s2019_s20, 16  ;;  %s1741_s11 = scalar_lea.vmem %s2019_s20, 32 }
  0x3a   : > { %p1735_p6 = scmp.ne.s32.totalorder %s2019_s20, %s1734_s18  ;;  %p1742_p3 = scmp.lt.s32.totalorder %s2019_s20, %s2019_s20 }
  0x3b   : > { %p1743_p5 = scmp.lt.s32.totalorder %s1741_s11, %s1734_s18 }
  0x3c   : > { %p1737_p8 = pnand %p1735_p6, %p2031_p13 }
  0x3d   : > { %p1744_p7 = por %p1743_p5, %p1742_p3 }
  0x3e   : > { %p1738_p0 = pneg %p1737_p8 }
  0x40   : > { %p1745_p10 = pnand %p1744_p7, %p1738_p0 }
  0x42   : > { %1748 = shalt.err (!%p1745_p10)
}
  0x43   : > { %1618 = dma.hbm_to_vmem [thread:$0]  (!%p2015_p11), %s2359_s6, 16, %s2019_s20, [#allocation6]  }
  0x44   : > { %s1749_s17 = scalar_lea.hbm %s2361_s8, 16 }
  0x45   : > { %p1750_p9 = scmp.ne.s32.totalorder %s2361_s8, %s1749_s17  ;;  %p1756_p1 = scmp.lt.u32.totalorder %s1749_s17, %s2361_s8 }
  0x47   : > { %p1752_p12 = pnand %p1750_p9, %p2031_p13 }
  0x49   : > { %p1753_p2 = pneg %p1752_p12 }
  0x4b   : > { %p1758_p4 = pnand %p1756_p1, %p1753_p2 }
  0x4d   : > { %1761 = shalt.err (!%p1758_p4)
}
  0x4e   : > { %s1762_s20 = scalar_lea.vmem %s2021_s23, 16  ;;  %s1769_s11 = scalar_lea.vmem %s2021_s23, 32 }
  0x4f   : > { %p1763_p6 = scmp.ne.s32.totalorder %s2021_s23, %s1762_s20  ;;  %p1770_p3 = scmp.lt.s32.totalorder %s2021_s23, %s2021_s23 }
  0x50   : > { %p1771_p5 = scmp.lt.s32.totalorder %s1769_s11, %s1762_s20 }
  0x51   : > { %p1765_p8 = pnand %p1763_p6, %p2031_p13 }
  0x52   : > { %p1772_p7 = por %p1771_p5, %p1770_p3 }
  0x53   : > { %p1766_p0 = pneg %p1765_p8 }
  0x55   : > { %p1773_p10 = pnand %p1772_p7, %p1766_p0 }
  0x57   : > { %1776 = shalt.err (!%p1773_p10)
}
  0x58   : > { %1621 = dma.hbm_to_vmem [thread:$0]  (!%p2015_p11), %s2361_s8, 16, %s2021_s23, [#allocation9]  }
  0x59   : > { %s2096_s19 = sadd.s32 1, %s1881_s28   ;;  %s38_s30 = sadd.s32 1, %s1877_s27 }
  0x5a   : > { %s35_s21 = ssub.s32 %s1881_s28, %s2096_s19  ;;  %p45_p9 = scmp.ne.s32.totalorder %s1877_s27, %s1873_s26 }
  0x5b   : > { %p36_p13 = scmp.eq.s32.totalorder %s35_s21, 0  ;;  %p46_p12 = scmp.eq.s32.totalorder %s1881_s28, 0 }
  0x5c   : > { %p1633_p2 = scmp.lt.s32.totalorder %s1881_s28, 2  ;;  %p2385_p4 = scmp.eq.s32.totalorder %s1987_s29, 1 }
  0x5d   : > { %s2106_s13 = scalar_select %p36_p13, %s1877_s27, %s38_s30  }
  0x5e   : > { %p47_p1 = por %p46_p12, %p45_p9  ;;  %p2110_p6 = por %p2385_p4, %p45_p9 }
  0x5f   : > { %s413_s22 = sand.u32 1, %s1877_s27   ;;  %s1426_s24 = sshll.u32 %s1881_s28, 7 }
  0x60   : > { %s1425_s23 = sshll.u32 %s413_s22, 3  ;;  %s2387_s0 = sld [smem:[#allocation17_spill]] }
  0x61   : > { %s417_s11 = scalar_lea.vmem [#allocation2], %s1425_s23  ;;  %p2121_p11 = pnand %p1633_p2, %p47_p1 }
  0x62   : > { %s424_s12 = sshll.u32 %s417_s11, 4  ;;  %s414_s21 = scalar_lea.sflag [#allocation3], %s413_s22  ;;  %s2125_s12 = int_to_ptr.vmem [resolvable:$true] %s424_s12 }
  0x63   : > { %p1779_p0 = pneg %p2121_p11 }
  0x66   : > { %s2119_s20 = scalar_lea.hbm %s2387_s0, %s1426_s24  ;;  %s1782_s25 = scalar_lea.hbm %s2387_s0, 256 }
  0x67   : > { %s1777_s30 = scalar_lea.hbm %s2119_s20, 128  ;;  %p1783_p7 = scmp.lt.u32.totalorder %s2119_s20, %s2387_s0 }
  0x68   : > { %p1778_p8 = scmp.ne.s32.totalorder %s2119_s20, %s1777_s30  ;;  %p1784_p10 = scmp.lt.u32.totalorder %s1782_s25, %s1777_s30 }
  0x69   : > { %p1786_p9 = scmp.lt.u32.totalorder %s1777_s30, %s2119_s20 }
  0x6a   : > { %p1780_p3 = pnand %p1779_p0, %p1778_p8  ;;  %p1785_p13 = por %p1784_p10, %p1783_p7 }
  0x6c   : > { %p1781_p5 = pneg %p1780_p3  ;;  %p1787_p12 = por %p1786_p9, %p1785_p13 }
  0x6e   : > { %p1788_p2 = pnand %p1787_p12, %p1781_p5 }
  0x70   : > { %1791 = shalt.err (!%p1788_p2)
}
  0x71   : > { %s1792_s22 = scalar_lea.vmem %s2125_s12, 128  ;;  %s1886_s24 = smov [#allocation2]  }
  0x72   : > { %p1793_p1 = scmp.ne.s32.totalorder %s2125_s12, %s1792_s22  ;;  %s1797_s23 = sshll.u32 %s1886_s24, 4  ;;  %s1798_s23 = int_to_ptr.vmem [resolvable:$false] %s1797_s23 }
  0x73   : > { %s1799_s18 = scalar_lea.vmem %s1798_s23, 256  ;;  %p1800_p3 = scmp.lt.s32.totalorder %s2125_s12, %s1798_s23 }
  0x74   : > { %p1795_p4 = pnand %p1793_p1, %p1779_p0  ;;  %p1801_p7 = scmp.lt.s32.totalorder %s1799_s18, %s1792_s22 }
  0x76   : > { %p1796_p8 = pneg %p1795_p4  ;;  %p1802_p10 = por %p1801_p7, %p1800_p3 }
  0x78   : > { %p1803_p13 = pnand %p1802_p10, %p1796_p8 }
  0x7a   : > { %1806 = shalt.err (!%p1803_p13)
}
  0x7b   : > { %1625 = dma.hbm_to_vmem [thread:$0]  (!%p2121_p11), %s2119_s20, 128, %s2125_s12, %s414_s21  }
  0x7c   : > { %p2389_p5 = scmp.ne.s32.totalorder %s2382_s16, 0 }
  0x7d   : > { %s2155_s30 = sand.u32 (!%p2389_p5), 1, %s1873_s26   ;;  %p2390_p0 = scmp.ne.s32.totalorder (!%p2389_p5), %s2379_s14, 0 }
  0x7e   : > { %433 = sbr.rel (%p2389_p5) target bundleno = 2521 (0x9d9), region = 72  ;;  %s1428_s25 = sshll.u32 (!%p2389_p5), %s2155_s30, 3 }
  0x7f   : > { %s436_s11 = scalar_lea.sflag (!%p2389_p5), [#allocation3], %s2155_s30  ;;  %s439_s22 = scalar_lea.vmem (!%p2389_p5), [#allocation2], %s1428_s25 }
  0x85   : > { %1852 = dma.done.wait (%p2390_p0), %s436_s11, 128  }
  0x86   : > { %1854 = vsyncadd (%p2390_p0), %s436_s11, 4294967168  ;;  %p2391_p11 = scmp.eq.s32.totalorder %s1987_s29, 0 }
  0x88   : > { %1856 = dma.done.wait (%p2391_p11), [#allocation6], 32   ;;  %p2392_p9 = pmov %p2391_p11 }
  0x8a   : > { %1858 = vsyncadd (%p2392_p9), [#allocation6], 4294967264  ;;  %p2393_p12 = pmov %p2392_p9 }
  0x8b   : > { %p2394_p2 = pmov %p2392_p9 }
  0x8c   : > { %1860 = dma.done.wait (%p2393_p12), [#allocation9], 16  }
  0x8d   : > { %1862 = vsyncadd (%p2394_p2), [#allocation9], 4294967280  ;;  %v1887_v0 = vmov 0.0|0.0   ;;  %vm1888_vm0 = vmmov 0   ;;  %v1889_v1 = vmov 0.0   ;;  %s2395_s1 = sld [smem:[#allocation18_spill]] }
  0x8e   : > { %1566 = vmatprep.subr.bf16.mxu0 %v1887_v0  ;;  %1499 = vmatprep.mubr.msk.f32.mxu0 %vm1888_vm0, %v1889_v1  ;;  %v2192_v8 = vld [vmem:[%s439_s22] sm:$0xff]  ;;  %vm506_vm1 = vcmask 261120   ;;  %s1890_s14 = smov 112   ;;  %s1891_s22 = smov 96   ;;  %vm583_vm2 = vcmask 130048   ;;  %vm658_vm3 = vcmask 64512  }
  0x8f   : > { %1507 = vmatprep.subr.mxu1 %v1889_v1  ;;  %1509 = vmatprep.mubr.msk.f32.mxu1 %vm1888_vm0, %v1889_v1  ;;  %v1433_v9 = vld [vmem:[%s2355_s2] ss:$0 sm:$0xff]  ;;  %s1892_s16 = smov 80   ;;  %s1893_s20 = smov 48   ;;  %v747_v38 = vld [vmem:[%s2356_s3 + $0x8] sm:$0xff]  ;;  %v1441_v43 = vld [vmem:[%s2356_s3 + $0x10] sm:$0xff] }
  0x90   : > { %s1894_s12 = smov 64   ;;  %v746_v37 = vld [vmem:[%s2356_s3] sm:$0xff]  ;;  %v1442_v44 = vld [vmem:[%s2356_s3 + $0x18] sm:$0xff]  ;;  %vm1201_vm4 = vcmask 523264   ;;  %s2396_s11 = sld [smem:[#allocation19_spill]] }
  0x91   : > { %v1576_v41 = vpack.c.bf16 %v747_v38, %v746_v37  ;;  %v1573_v45 = vpack.c.bf16 %v1442_v44, %v1441_v43  ;;  %v1445_v53 = vld [vmem:[%s2357_s4] ss:$0 sm:$0xff]  ;;  %s2398_s0 = sld [smem:[#allocation21_spill]]  ;;  %s1307_s23 = scalar_lea.sflag [#allocation4], %s2155_s30 }
  0x93   : > { %v495_v2 = vld [vmem:[%s2395_s1] sm:$0xff]  ;;  %v496_v3 = vld [vmem:[%s2395_s1 + $0x8] sm:$0xff]  ;;  %v497_v4 = vld [vmem:[%s2395_s1 + $0x10] sm:$0xff] }
  0x94   : > { %v1567_v5 = vpack.c.bf16 %v496_v3, %v495_v2  ;;  %v498_v6 = vld [vmem:[%s2395_s1 + $0x18] sm:$0xff]  ;;  %v1102_v2 = vld [vmem:[%s2360_s7 + $0x8] sm:$0xff] }
  0x95   : > { %v1570_v7 = vpack.c.bf16 %v498_v6, %v497_v4  ;;  %v1103_v4 = vld [vmem:[%s2360_s7 + $0x10] sm:$0xff] }
  0x96   : > { %1568 = vmatpush3.bf16.msra.mxu0 %v1567_v5  ;;  %v1104_v5 = vld [vmem:[%s2360_s7 + $0x18] sm:$0xff] }
  0x97   : > { %1569 = vmatprep.subr.bf16.mxu0 %v1887_v0  ;;  %v1582_v6 = vpack.c.bf16 %v1104_v5, %v1103_v4 }
  0x9a   : > { %1571 = vmatpush3.bf16.msra.mxu0 %v1570_v7  ;;  %v1186_v7 = vld [vmem:[%s2362_s9] sm:$0xff] }
  0x9b   : > { %1502 = vmatprep.subr.mxu0 %v1889_v1 }
  0x9d   : > { %1500 = vmatmul.mubr.msk.f32.vlgmr.msra.gmra.mrb[0].mxu0 %vm506_vm1, %v2192_v8 }
  0x9e   : > { %1504 = vmatprep.mubr.msk.f32.mxu0 %vm1888_vm0, %v1889_v1 }
 0x170   : > { %v576_v10 = vpop.f32.mrb[0].mxu0 }
 0x171   : > { %v577_v11 = vadd.f32 %v1433_v9, %v576_v10  ;;  %v1501_v12 = vpop.f32.mrb[1].mxu0  ;;  %v1188_v9 = vld [vmem:[%s2362_s9 + $0x10] sm:$0xff] }
 0x173   : > { %748 = vrot.lane.b32.xlu1 %v577_v11, %s1890_s14  ;;  %581 = vrot.lane.b32.xlu0 %v577_v11, %s1891_s22 }
 0x177   : > { %750 = vrot.lane.b32.xlu0 %v577_v11, %s1892_s16  ;;  %s2397_s16 = sld [smem:[#allocation20_spill]] }
 0x1e5   : > { %v582_v13 = vpop.permute.xlu0 %581  ;;  %v749_v15 = vpop.permute.xlu1 %748 }
 0x1e6   : > { %1503 = vmatpush3.xpose.msk.msra.mxu0 %vm583_vm2, %v582_v13  ;;  %v1190_v13 = vld [vmem:[%s2362_s9 + $0x20] sm:$0xff] }
 0x1e7   : > { %1512 = vmatprep.subr.mxu0 %v1889_v1 }
 0x1e9   : > { %1505 = vmatmul.mubr.msk.f32.vlgmr.msra.gmra.mrb[2].mxu0 %vm583_vm2, %v577_v11  ;;  %v751_v14 = vpop.permute.xlu0 %750 }
 0x1ea   : > { %1513 = vmatpush3.xpose.msk.msra.mxu0 %vm583_vm2, %v751_v14  ;;  %1514 = vmatprep.mubr.msk.f32.mxu0 %vm1888_vm0, %v1889_v1  ;;  %v1191_v14 = vld [vmem:[%s2362_s9 + $0x28] sm:$0xff] }
 0x1eb   : > { %1572 = vmatprep.subr.bf16.mxu0 %v1887_v0 }
 0x1ed   : > { %1515 = vmatmul.mubr.msk.f32.vlgmr.msra.gmra.mrb[4].mxu0 %vm583_vm2, %v749_v15  ;;  %v1591_v15 = vpack.c.bf16 %v1191_v14, %v1190_v13 }
 0x1ee   : > { %1526 = vmatprep.mubr.msk.f32.mxu0 %vm1888_vm0, %v1889_v1  ;;  %1574 = vmatpush3.bf16.msra.mxu0 %v1573_v45 }
 0x1ef   : > { %1578 = vmatprep.subr.bf16.mxu0 %v1887_v0 }
 0x2bc   : > { %v654_v16 = vpop.f32.mrb[2].mxu0 }
 0x2bd   : > { %v1506_v17 = vpop.f32.mrb[3].mxu0  ;;  %v659_v18 = vsel %vm658_vm3, %v654_v16, -inf }
 0x2be   : > { %660 = vmax.xlane.f32.xlu1 %v659_v18 }
 0x2c0   : > { %v822_v19 = vpop.f32.mrb[4].mxu0 }
 0x2c1   : > { %v1516_v20 = vpop.f32.mrb[5].mxu0  ;;  %v826_v21 = vsel %vm658_vm3, %v822_v19, -inf }
 0x2c2   : > { %827 = vmax.xlane.f32.xlu0 %v826_v21  ;;  %v1446_v20 = vld [vmem:[#allocation5] ss:$0 sm:$0xff] }
 0x34b   : > { %v661_v22 = vpop.xlane.xlu1 %660 }
 0x34c   : > { %v662_v23 = vsub.f32 %v654_v16, %v661_v22  ;;  %v1447_v22 = vld [vmem:[#allocation7] ss:$0 sm:$0xff] }
 0x34e   : > { %v663_v24 = vmul.f32 1.442695, %v662_v23 }
 0x34f   : > { %v828_v25 = vpop.xlane.xlu0 %827 }
 0x350   : > { %1681 = vpow2.f32 %v663_v24  ;;  %v829_v26 = vsub.f32 %v822_v19, %v828_v25  ;;  %v1192_v25 = vld [vmem:[%s2362_s9 + $0x30] sm:$0xff] }
 0x352   : > { %v830_v27 = vmul.f32 1.442695, %v829_v26 }
 0x354   : > { %1683 = vpow2.f32 %v830_v27  ;;  %v1448_v27 = vld [vmem:[#allocation8] ss:$0 sm:$0xff] }
 0x35a   : > { %v1682_v28 = vpop.eup %1681 }
 0x35b   : > { %v665_v29 = vsel %vm658_vm3, %v1682_v28, 0.0 }
 0x35c   : > { %666 = vadd.xlane.f32.xlu0 %v665_v29 }
 0x35e   : > { %v1684_v30 = vpop.eup %1683 }
 0x35f   : > { %v832_v31 = vsel %vm658_vm3, %v1684_v30, 0.0 }
 0x360   : > { %833 = vadd.xlane.f32.xlu1 %v832_v31 }
 0x371   : > { %837 = vrot.lane.b32.xlu1 %v577_v11, %s1893_s20  ;;  %s1455_s20 = sshll.u32 %s1987_s29, 7  ;;  %s1895_s29 = smov [#allocation10]  }
 0x372   : > { %670 = vrot.lane.b32.xlu0 %v577_v11, %s1894_s12  ;;  %v1189_v11 = vld [vmem:[%s2362_s9 + $0x18] sm:$0xff]  ;;  %s493_s12 = scalar_lea.vmem [#allocation10], %s1428_s25  ;;  %s2308_s1 = scalar_lea.hbm %s2398_s0, %s1455_s20 }
 0x373   : > { %v1588_v12 = vpack.c.bf16 %v1189_v11, %v1188_v9  ;;  %s1320_s15 = sshll.u32 %s493_s12, 4  ;;  %s1811_s25 = sshll.u32 %s1895_s29, 4  ;;  %s2310_s15 = int_to_ptr.vmem [resolvable:$true] %s1320_s15  ;;  %s1812_s25 = int_to_ptr.vmem [resolvable:$false] %s1811_s25 }
 0x374   : > { %s1807_s18 = scalar_lea.vmem %s2310_s15, 128  ;;  %p1814_p3 = scmp.lt.s32.totalorder %s2310_s15, %s1812_s25 }
 0x375   : > { %p1808_p1 = scmp.ne.s32.totalorder %s2310_s15, %s1807_s18 }
 0x377   : > { %p1809_p4 = pnand %p1808_p1, %p2110_p6 }
 0x379   : > { %p1810_p8 = pneg %p1809_p4 }
 0x3e9   : > { %v667_v32 = vpop.xlane.xlu0 %666 }
 0x3ea   : > { %1685 = vrcp.f32 %v667_v32  ;;  %v1450_v32 = vld [vmem:[%s2363_s10] ss:$0 sm:$0xff] }
 0x3ed   : > { %v834_v33 = vpop.xlane.xlu1 %833  ;;  %v671_v34 = vpop.permute.xlu0 %670 }
 0x3ee   : > { %1687 = vrcp.f32 %v834_v33  ;;  %1508 = vmatpush3.msra.mxu1 %v671_v34 }
 0x3ef   : > { %1517 = vmatprep.subr.mxu1 %v1889_v1 }
 0x3f1   : > { %v838_v39 = vpop.permute.xlu1 %837 }
 0x3f4   : > { %v1686_v35 = vpop.eup %1685 }
 0x3f5   : > { %v669_v36 = vmul.f32 %v1686_v35, %v1682_v28 }
 0x3f7   : > { %1510 = vmatmul.mubr.msk.f32.vlgmr.msra.gmra.mrb[0].mxu1 %vm658_vm3, %v669_v36 }
 0x3f8   : > { %v1688_v40 = vpop.eup %1687  ;;  %1518 = vmatpush3.msra.mxu1 %v838_v39  ;;  %1519 = vmatprep.mubr.msk.f32.mxu1 %vm1888_vm0, %v1889_v1 }
 0x3f9   : > { %v836_v42 = vmul.f32 %v1688_v40, %v1684_v30  ;;  %1575 = vmatprep.subr.bf16.mxu1 %v1887_v0 }
 0x3fb   : > { %1520 = vmatmul.mubr.msk.f32.vlgmr.msra.gmra.mrb[2].mxu1 %vm658_vm3, %v836_v42 }
 0x3fc   : > { %1577 = vmatpush3.bf16.msra.mxu1 %v1576_v41  ;;  %1533 = vmatprep.mubr.msk.f32.mxu1 %vm1888_vm0, %v1889_v1 }
 0x3fd   : > { %1584 = vmatprep.subr.bf16.mxu1 %v1887_v0 }
 0x4ca   : > { %v742_v46 = vpop.f32.mrb[0].mxu1 }
 0x4cb   : > { %v1511_v47 = vpop.f32.mrb[1].mxu1  ;;  %1534 = vmatmul.mubr.msk.f32.vlgmr.msra.gmra.mrb[4].mxu1 %vm583_vm2, %v742_v46 }
 0x4cc   : > { %1563 = vmatprep.mubr.msk.f32.mxu1 %vm1888_vm0, %v1889_v1  ;;  %v1452_v47 = vld [vmem:[%s2396_s11] ss:$0 sm:$0xff]  ;;  %s1813_s11 = scalar_lea.vmem %s1812_s25, 256 }
 0x4cd   : > { %p1815_p7 = scmp.lt.s32.totalorder %s1813_s11, %s1807_s18 }
 0x4ce   : > { %v909_v48 = vpop.f32.mrb[2].mxu1 }
 0x4cf   : > { %v1521_v49 = vpop.f32.mrb[3].mxu1  ;;  %1527 = vmatmul.mubr.msk.f32.vlgmr.msra.gmra.mrb[6].mxu0 %vm583_vm2, %v909_v48  ;;  %p1816_p10 = por %p1815_p7, %p1814_p3 }
 0x4d0   : > { %1544 = vmatprep.mubr.msk.f32.mxu0 %vm1888_vm0, %v1889_v1  ;;  %v1101_v1 = vld [vmem:[%s2360_s7] sm:$0xff] }
 0x4d1   : > { %v1579_v3 = vpack.c.bf16 %v1102_v2, %v1101_v1  ;;  %v1453_v49 = vld [vmem:[%s2397_s16] ss:$0 sm:$0xff]  ;;  %p1817_p13 = pnand %p1816_p10, %p1810_p8 }
 0x4d3   : > { %1580 = vmatpush3.bf16.msra.mxu0 %v1579_v3 }
 0x4d4   : > { %1581 = vmatprep.subr.bf16.mxu0 %v1887_v0 }
 0x4d7   : > { %1583 = vmatpush3.bf16.msra.mxu0 %v1582_v6 }
 0x59e   : > { %v1058_v50 = vpop.f32.mrb[4].mxu1 }
 0x59f   : > { %v1535_v51 = vpop.f32.mrb[5].mxu1 }
 0x5a2   : > { %v985_v52 = vpop.f32.mrb[6].mxu0 }
 0x5a3   : > { %v1059_v54 = vadd.f32 %v1058_v50, %v985_v52  ;;  %v1528_v55 = vpop.f32.mrb[7].mxu0 }
 0x5a5   : > { %v1069_v56 = vadd.f32 %v1445_v53, %v1059_v54 }
 0x5a7   : > { %v1070_v57 = vadd.f32 %v1069_v56, %v2192_v8  ;;  %v1187_v8 = vld [vmem:[%s2362_s9 + $0x8] sm:$0xff] }
 0x5a8   : > { %v1585_v10 = vpack.c.bf16 %v1187_v8, %v1186_v7 }
 0x5a9   : > { %v1071_v58 = vsel %vm506_vm1, %v1070_v57, 0.0 }
 0x5aa   : > { %1072 = vadd.xlane.f32.xlu1 %v1071_v58  ;;  %1586 = vmatpush3.bf16.msra.mxu1 %v1585_v10 }
 0x5ab   : > { %1587 = vmatprep.subr.bf16.mxu1 %v1887_v0 }
 0x5ae   : > { %1589 = vmatpush3.bf16.msra.mxu1 %v1588_v12 }
 0x5af   : > { %1590 = vmatprep.subr.bf16.mxu1 %v1887_v0 }
 0x5b2   : > { %1592 = vmatpush3.bf16.msra.mxu1 %v1591_v15 }
 0x5b3   : > { %1593 = vmatprep.subr.bf16.mxu1 %v1887_v0  ;;  %v1193_v0 = vld [vmem:[%s2362_s9 + $0x38] sm:$0xff] }
 0x5b4   : > { %v1594_v26 = vpack.c.bf16 %v1193_v0, %v1192_v25 }
 0x5b6   : > { %1595 = vmatpush3.bf16.msra.mxu1 %v1594_v26 }
 0x637   : > { %v1073_v59 = vpop.xlane.xlu1 %1072 }
 0x638   : > { %v1075_v60 = vmul.f32 0.03125, %v1073_v59 }
 0x63a   : > { %v1076_v61 = vsub.f32 %v1070_v57, %v1075_v60 }
 0x63c   : > { %v1077_v62 = vmul.f32 %v1076_v61, %v1076_v61 }
 0x63e   : > { %v1078_v63 = vsel %vm506_vm1, %v1077_v62, 0.0 }
 0x63f   : > { %1079 = vadd.xlane.f32.xlu0 %v1078_v63 }
 0x6cc   : > { %v1080_v16 = vpop.xlane.xlu0 %1079 }
 0x6cd   : > { %v1081_v17 = vmul.f32 0.03125, %v1080_v16 }
 0x6cf   : > { %v1082_v18 = vadd.f32 1e-05, %v1081_v17 }
 0x6d1   : > { %1689 = vrsqrt.f32 %v1082_v18 }
 0x6db   : > { %v1690_v19 = vpop.eup %1689 }
 0x6dc   : > { %v1084_v21 = vmul.f32 %v1690_v19, %v1076_v61 }
 0x6de   : > { %v1092_v23 = vmul.f32 %v1446_v20, %v1084_v21 }
 0x6e0   : > { %v1100_v24 = vadd.f32 %v1447_v22, %v1092_v23 }
 0x6e2   : > { %1545 = vmatmul.mubr.msk.f32.vlgmr.msra.gmra.mrb[8].mxu0 %vm506_vm1, %v1100_v24 }
 0x7b5   : > { %v1181_v28 = vpop.f32.mrb[8].mxu0 }
 0x7b6   : > { %v1182_v29 = vadd.f32 %v1448_v27, %v1181_v28  ;;  %v1546_v30 = vpop.f32.mrb[9].mxu0 }
 0x7b8   : > { %v1185_v31 = vmax.f32 %v1182_v29, 0.0 }
 0x7ba   : > { %1564 = vmatmul.mubr.msk.f32.vlgmr.msra.gmra.mrb[6].mxu1 %vm1201_vm4, %v1185_v31 }
 0x88d   : > { %v1271_v33 = vpop.f32.mrb[6].mxu1 }
 0x88e   : > { %v1272_v34 = vadd.f32 %v1450_v32, %v1271_v33  ;;  %v1565_v35 = vpop.f32.mrb[7].mxu1 }
 0x890   : > { %v1275_v36 = vadd.f32 %v1272_v34, %v1100_v24 }
 0x892   : > { %v1276_v37 = vsel %vm506_vm1, %v1275_v36, 0.0 }
 0x893   : > { %1277 = vadd.xlane.f32.xlu0 %v1276_v37 }
 0x920   : > { %v1278_v38 = vpop.xlane.xlu0 %1277 }
 0x921   : > { %v1279_v39 = vmul.f32 0.03125, %v1278_v38 }
 0x923   : > { %v1280_v40 = vsub.f32 %v1275_v36, %v1279_v39 }
 0x925   : > { %v1281_v41 = vmul.f32 %v1280_v40, %v1280_v40 }
 0x927   : > { %v1282_v42 = vsel %vm506_vm1, %v1281_v41, 0.0 }
 0x928   : > { %1283 = vadd.xlane.f32.xlu1 %v1282_v42 }
 0x9b5   : > { %v1284_v43 = vpop.xlane.xlu1 %1283 }
 0x9b6   : > { %v1285_v44 = vmul.f32 0.03125, %v1284_v43 }
 0x9b8   : > { %v1286_v45 = vadd.f32 1e-05, %v1285_v44 }
 0x9ba   : > { %1691 = vrsqrt.f32 %v1286_v45 }
 0x9c4   : > { %v1692_v46 = vpop.eup %1691 }
 0x9c5   : > { %v1288_v48 = vmul.f32 %v1692_v46, %v1280_v40 }
 0x9c7   : > { %v1296_v50 = vmul.f32 %v1452_v47, %v1288_v48 }
 0x9c9   : > { %v1304_v51 = vadd.f32 %v1453_v49, %v1296_v50 }
 0x9cb   : > { %1305 = vst.msk [vmem:[%s493_s12] sm:$0xff] %vm506_vm1, %v1304_v51 }
 0x9cc   : > { %1820 = shalt.err (!%p1817_p13)
}
 0x9cd   : > { %s1821_s30 = scalar_lea.hbm %s2308_s1, 128  ;;  %s1825_s16 = scalar_lea.hbm %s2398_s0, 256 }
 0x9ce   : > { %p1822_p5 = scmp.ne.s32.totalorder %s2308_s1, %s1821_s30  ;;  %p1826_p9 = scmp.lt.u32.totalorder %s2308_s1, %s2398_s0 }
 0x9cf   : > { %p1827_p12 = scmp.lt.u32.totalorder %s1825_s16, %s1821_s30  ;;  %p1829_p1 = scmp.lt.u32.totalorder %s1821_s30, %s2308_s1 }
 0x9d0   : > { %p1823_p0 = pnand %p1822_p5, %p2110_p6 }
 0x9d1   : > { %p1828_p2 = por %p1827_p12, %p1826_p9 }
 0x9d2   : > { %p1824_p11 = pneg %p1823_p0 }
 0x9d3   : > { %p1830_p4 = por %p1829_p1, %p1828_p2 }
 0x9d5   : > { %p1831_p8 = pnand %p1830_p4, %p1824_p11 }
 0x9d7   : > { %1834 = shalt.err (!%p1831_p8)
}
 0x9d8   : > { %1610 = dma.vmem_to_hbm [thread:$0]  (%p2110_p6), %s2310_s15, 128, %s2308_s1, %s1307_s23  }
 0x9d9 PF: > { %s2399_s21 = sld [smem:[#allocation15_spill]]  ;;  %s2400_s24 = sld [smem:[#allocation16_spill]] }
 0x9da   : > { %p2402_p7 = scmp.ge.s32.totalorder %s1881_s28, 2 }
 0x9df   : > { %s1332_s18 = sand.u32 1, %s2399_s21   ;;  %p2401_p3 = scmp.ne.s32.totalorder %s2400_s24, 0 }
 0x9e0   : > { %s1333_s29 = scalar_lea.sflag [#allocation4], %s1332_s18 }
 0x9e1   : > { %p1627_p10 = pnand %p2402_p7, %p2401_p3 }
 0x9e3   : > { %1864 = dma.done.wait (!%p1627_p10), %s1333_s29, 128  }
 0x9e4   : > { %1866 = vsyncadd (!%p1627_p10), %s1333_s29, 4294967168  ;;  %p28_p13 = scmp.ge.s32.totalorder %s2096_s19, 4   ;;  %s2403_s25 = smov %s1873_s26 }
 0x9e5   : > { %s2404_s26 = smov %s1877_s27  ;;  %s2405_s27 = smov %s2106_s13 }
 0x9e6   : > { %s2406_s28 = smov %s2096_s19  ;;  %30 = sbr.rel (!%p28_p13) target bundleno = 13 (0xd), region = 130 }
 0x9ed   :  { %1338 = vsyncpa [#allocation3], 1 }
 0x9ee   :  { %1340 = vsyncpa [#allocation3 + $0x1], 1 }
 0x9ef   :  { %1341 = vsyncpa [#allocation6], 1 }
 0x9f0   :  { %1342 = vsyncpa [#allocation9], 1 }
 0x9f1   :  { %1343 = vsyncpa [#allocation4], 1 }
 0x9f2   :  { %1345 = vsyncpa [#allocation4 + $0x1], 1 }

</bundles_post_ra>
